<compile_context>
chip_gen: v7x
topology: tpu7x:2x2x1
jax: 0.10.0
libtpu: 0.0.40
codegen_flags: <defaults>
</compile_context>

<pallas_src>
import jax
import jax.numpy as jnp
from jax.experimental import pallas as pl
from jax.experimental.pallas import tpu as pltpu

INPUT_SIZE = 3
HIDDEN_SIZE = 50
OUTPUT_SIZE = 3
HIDDEN_PAD = 128      # per-gate lane width (vreg-aligned gate boundaries)
TILE_B = 8            # batch tile (sublane width)


def lstm_fc_kernel(x_ref, wih_ref, whh_ref, b_ref, wfc_ref, bfc_ref,
                   out_ref, xproj_ref):
    """One batch tile: full LSTM recurrence + final Linear.

    x_ref:     (T*B, I)    time-major, flattened over (T, B) for this tile
    wih_ref:   (I, 4*HP)   fused gate input weights, gate order i|f|o|g
    whh_ref:   (HP, 4*HP)  fused gate recurrent weights
    b_ref:     (1, 4*HP)   b_ih + b_hh, fused
    wfc_ref:   (HP, O), bfc_ref: (1, O)
    out_ref:   (B, O)
    xproj_ref: (T*B, 4*HP) VMEM scratch for the hoisted input projection
    """
    TB = x_ref.shape[0]
    B = out_ref.shape[0]
    T = TB // B
    HP = whh_ref.shape[0]
    H3 = 3 * HP

    # Input projection hoisted out of the recurrence (one matmul for all T),
    # bias folded in once, staged in VMEM so it is not live in vregs.
    xproj_ref[...] = (
        jnp.dot(x_ref[...], wih_ref[...], preferred_element_type=jnp.float32)
        + b_ref[...])

    def step(t, carry):
        h, c = carry
        start = pl.multiple_of(t * B, B)
        # Accumulate-into form: start from the per-step x projection, add the
        # recurrent matmul (v7x MRB can fold the add; neutral on v5e/v6e).
        acc = xproj_ref[pl.ds(start, B), :]                              # (B, 4HP)
        acc += jnp.dot(h, whh_ref[...], preferred_element_type=jnp.float32)

        # Gate order along lanes: i | f | o | g  (all 128-lane aligned).
        sig = jax.nn.sigmoid(acc[:, :H3])        # one EUP region: i, f, o
        g_g = jnp.tanh(acc[:, H3:])              # one EUP region: g
        i_g = sig[:, 0 * HP:1 * HP]
        f_g = sig[:, 1 * HP:2 * HP]
        o_g = sig[:, 2 * HP:3 * HP]

        c = f_g * c + i_g * g_g
        h = o_g * jnp.tanh(c)
        return h, c

    h0 = jnp.zeros((B, HP), dtype=jnp.float32)
    c0 = jnp.zeros((B, HP), dtype=jnp.float32)
    h, _ = jax.lax.fori_loop(0, T, step, (h0, c0), unroll=min(T, 8))

    # Final fully-connected layer on the last hidden state.
    out_ref[...] = (jnp.dot(h, wfc_ref[...], preferred_element_type=jnp.float32)
                    + bfc_ref[...])


def _fuse_lstm_weights(params, H, HP):
    """Fused, lane-padded, reordered (i|f|o|g) LSTM gate weights."""
    def gate_blocks(w):
        return [w[k * H:(k + 1) * H] for k in range(4)]   # PyTorch order i|f|g|o

    order = (0, 1, 3, 2)   # -> i | f | o | g (sigmoid gates contiguous)

    wi_blocks = gate_blocks(params["w_ih"])                 # each (H, I)
    wh_blocks = gate_blocks(params["w_hh"])                 # each (H, H)
    b_blocks = gate_blocks(params["b_ih"] + params["b_hh"])  # each (H,)

    wih = jnp.concatenate(
        [jnp.pad(wi_blocks[k].T, ((0, 0), (0, HP - H))) for k in order],
        axis=1).astype(jnp.float32)                          # (I, 4HP)
    whh = jnp.concatenate(
        [jnp.pad(wh_blocks[k].T, ((0, HP - H), (0, HP - H))) for k in order],
        axis=1).astype(jnp.float32)                          # (HP, 4HP)
    b = jnp.concatenate(
        [jnp.pad(b_blocks[k], (0, HP - H)) for k in order]
    ).reshape(1, 4 * HP).astype(jnp.float32)                 # (1, 4HP)
    return wih, whh, b


def init_params(key, input_size=INPUT_SIZE, hidden_size=HIDDEN_SIZE,
                output_size=OUTPUT_SIZE):
    """Deterministic init mimicking PyTorch's U(-1/sqrt(H), 1/sqrt(H))."""
    ks = jax.random.split(key, 6)
    k_lstm = 1.0 / jnp.sqrt(hidden_size)
    k_fc = 1.0 / jnp.sqrt(hidden_size)
    u = lambda k, shape, s: jax.random.uniform(k, shape, jnp.float32, -s, s)
    return dict(
        w_ih=u(ks[0], (4 * hidden_size, input_size), k_lstm),
        w_hh=u(ks[1], (4 * hidden_size, hidden_size), k_lstm),
        b_ih=u(ks[2], (4 * hidden_size,), k_lstm),
        b_hh=u(ks[3], (4 * hidden_size,), k_lstm),
        w_fc=u(ks[4], (output_size, hidden_size), k_fc),
        b_fc=u(ks[5], (output_size,), k_fc),
    )


def lstm_model_forward(x, params, *, tile_b=TILE_B):
    """x: (B, T, I) float32 (batch_first, like the PyTorch module). Returns (B, O)."""
    B, T, I = x.shape
    H, O, HP = HIDDEN_SIZE, OUTPUT_SIZE, HIDDEN_PAD

    wih, whh, b = _fuse_lstm_weights(params, H, HP)
    wfc = jnp.pad(params["w_fc"].T.astype(jnp.float32), ((0, HP - H), (0, 0)))  # (HP, O)
    bfc = params["b_fc"].reshape(1, O).astype(jnp.float32)                       # (1, O)

    # Pad batch to a multiple of tile_b and lay the input out per batch tile as
    # time-major flattened (G, T*tile_b, I), so the in-kernel input projection
    # is a single 2-D matmul per tile.
    B_pad = ((B + tile_b - 1) // tile_b) * tile_b
    G = B_pad // tile_b
    xp = x.astype(jnp.float32)
    if B_pad != B:
        xp = jnp.pad(xp, ((0, B_pad - B), (0, 0), (0, 0)))
    xp = xp.reshape(G, tile_b, T, I).transpose(0, 2, 1, 3).reshape(G, T * tile_b, I)

    out = pl.pallas_call(
        lstm_fc_kernel,
        out_shape=jax.ShapeDtypeStruct((G, tile_b, O), jnp.float32),
        grid=(G,),
        in_specs=[
            pl.BlockSpec((None, T * tile_b, I), lambda g: (g, 0, 0)),  # x tile
            pl.BlockSpec((I, 4 * HP), lambda g: (0, 0)),               # wih
            pl.BlockSpec((HP, 4 * HP), lambda g: (0, 0)),              # whh
            pl.BlockSpec((1, 4 * HP), lambda g: (0, 0)),               # bias
            pl.BlockSpec((HP, O), lambda g: (0, 0)),                   # wfc
            pl.BlockSpec((1, O), lambda g: (0, 0)),                    # bfc
        ],
        out_specs=pl.BlockSpec((None, tile_b, O), lambda g: (g, 0, 0)),
        scratch_shapes=[pltpu.VMEM((T * tile_b, 4 * HP), jnp.float32)],
        compiler_params=pltpu.CompilerParams(
            dimension_semantics=("parallel",)),
    )(xp, wih, whh, b, wfc, bfc)

    return out.reshape(B_pad, O)[:B]


def lstm_model_reference(x, params):
    """Pure-JAX reference matching torch.nn.LSTM(batch_first=True) + Linear."""
    B, T, I = x.shape
    H = HIDDEN_SIZE
    w_ih, w_hh = params["w_ih"], params["w_hh"]
    b = params["b_ih"] + params["b_hh"]
    h = jnp.zeros((B, H), jnp.float32)
    c = jnp.zeros((B, H), jnp.float32)
    for t in range(T):
        gates = x[:, t, :] @ w_ih.T + h @ w_hh.T + b
        i_g = jax.nn.sigmoid(gates[:, 0 * H:1 * H])
        f_g = jax.nn.sigmoid(gates[:, 1 * H:2 * H])
        g_g = jnp.tanh(gates[:, 2 * H:3 * H])
        o_g = jax.nn.sigmoid(gates[:, 3 * H:4 * H])
        c = f_g * c + i_g * g_g
        h = o_g * jnp.tanh(c)
    return h @ params["w_fc"].T + params["b_fc"]


if __name__ == "__main__":
    key = jax.random.PRNGKey(0)
    k_param, k_x = jax.random.split(key)

    params = init_params(k_param)
    B, T = 2, 8
    x = jax.random.normal(k_x, (B, T, INPUT_SIZE), dtype=jnp.float32)

    out = lstm_model_forward(x, params)
    out = jax.block_until_ready(out)

    ref = lstm_model_reference(x, params)
    assert out.shape == (B, OUTPUT_SIZE)
    assert jnp.allclose(out, ref, atol=1e-4, rtol=1e-4), "mismatch vs reference"

    print("KERNEL_OK")
</pallas_src>

<mosaic_0001>
module attributes {stable_mosaic.version = 11 : i64} {
  func.func @lstm_fc_kernel(%arg0: i32, %arg1: memref<1x64x3xf32, #tpu.memory_space<vmem>>, %arg2: memref<3x512xf32, #tpu.memory_space<vmem>>, %arg3: memref<128x512xf32, #tpu.memory_space<vmem>>, %arg4: memref<1x512xf32, #tpu.memory_space<vmem>>, %arg5: memref<128x3xf32, #tpu.memory_space<vmem>>, %arg6: memref<1x3xf32, #tpu.memory_space<vmem>>, %arg7: memref<1x8x3xf32, #tpu.memory_space<vmem>>, %arg8: memref<64x512xf32, #tpu.memory_space<vmem>>) attributes {dimension_semantics = [#tpu.dimension_semantics<parallel>], iteration_bounds = array<i64: 1>, scalar_prefetch = 0 : i64, scratch_operands = 1 : i64, tpu.core_type = #tpu.core_type<tc>, window_params = [{transform_indices = @transform_0, window_bounds = array<i64: 1, 64, 3>}, {pipeline_mode = #tpu.pipeline_mode<synchronous>, transform_indices = @transform_1, window_bounds = array<i64: 3, 512>}, {pipeline_mode = #tpu.pipeline_mode<synchronous>, transform_indices = @transform_2, window_bounds = array<i64: 128, 512>}, {pipeline_mode = #tpu.pipeline_mode<synchronous>, transform_indices = @transform_3, window_bounds = array<i64: 1, 512>}, {pipeline_mode = #tpu.pipeline_mode<synchronous>, transform_indices = @transform_4, window_bounds = array<i64: 128, 3>}, {pipeline_mode = #tpu.pipeline_mode<synchronous>, transform_indices = @transform_5, window_bounds = array<i64: 1, 3>}, {transform_indices = @transform_6, window_bounds = array<i64: 1, 8, 3>}]} {
    %c0 = arith.constant 0 : index
    %c0_0 = arith.constant 0 : index
    %c0_1 = arith.constant 0 : index
    %0 = vector.load %arg1[%c0, %c0_0, %c0_1] : memref<1x64x3xf32, #tpu.memory_space<vmem>>, vector<1x64x3xf32>
    %1 = vector.shape_cast %0 : vector<1x64x3xf32> to vector<64x3xf32>
    %c0_2 = arith.constant 0 : index
    %c0_3 = arith.constant 0 : index
    %2 = vector.load %arg2[%c0_2, %c0_3] : memref<3x512xf32, #tpu.memory_space<vmem>>, vector<3x512xf32>
    %cst = arith.constant dense<0.000000e+00> : vector<64x512xf32>
    %3 = tpu.matmul %1, %2, %cst {dimension_numbers = #tpu.dot_dimension_numbers<[1], [0], [0], [1], [0, 0, 1, 1], [], []>} : vector<64x3xf32>, vector<3x512xf32>, vector<64x512xf32> -> vector<64x512xf32>
    %c0_4 = arith.constant 0 : index
    %c0_5 = arith.constant 0 : index
    %4 = vector.load %arg4[%c0_4, %c0_5] : memref<1x512xf32, #tpu.memory_space<vmem>>, vector<1x512xf32>
    %5 = vector.broadcast %4 : vector<1x512xf32> to vector<64x512xf32>
    %6 = arith.addf %3, %5 : vector<64x512xf32>
    %c0_6 = arith.constant 0 : index
    %c0_7 = arith.constant 0 : index
    %7 = vector.load %arg8[%c0_6, %c0_7] : memref<64x512xf32, #tpu.memory_space<vmem>>, vector<64x512xf32>
    tpu.vector_store %arg8[%c0_6, %c0_7], %6 {strides = array<i32>} : memref<64x512xf32, #tpu.memory_space<vmem>>, vector<64x512xf32>,
    %cst_8 = arith.constant 0.000000e+00 : f32
    %8 = vector.broadcast %cst_8 : f32 to vector<8x128xf32>
    %cst_9 = arith.constant 0.000000e+00 : f32
    %9 = vector.broadcast %cst_9 : f32 to vector<8x128xf32>
    %c0_i32 = arith.constant 0 : i32
    %c8_i32 = arith.constant 8 : i32
    %10 = arith.muli %c0_i32, %c8_i32 : i32
    %11 = tpu.assume_multiple %10, 8 : i32
    %12 = arith.index_cast %11 : i32 to index
    %c0_10 = arith.constant 0 : index
    %13 = vector.load %arg8[%12, %c0_10] : memref<64x512xf32, #tpu.memory_space<vmem>>, vector<8x512xf32>
    %c0_11 = arith.constant 0 : index
    %c0_12 = arith.constant 0 : index
    %14 = vector.load %arg3[%c0_11, %c0_12] : memref<128x512xf32, #tpu.memory_space<vmem>>, vector<128x512xf32>
    %cst_13 = arith.constant dense<0.000000e+00> : vector<8x512xf32>
    %15 = tpu.matmul %8, %14, %cst_13 {dimension_numbers = #tpu.dot_dimension_numbers<[1], [0], [0], [1], [0, 0, 1, 1], [], []>} : vector<8x128xf32>, vector<128x512xf32>, vector<8x512xf32> -> vector<8x512xf32>
    %16 = arith.addf %13, %15 : vector<8x512xf32>
    %17 = vector.extract_strided_slice %16 {offsets = [0, 0], sizes = [8, 384], strides = [1, 1]} : vector<8x512xf32> to vector<8x384xf32>
    %18 = arith.negf %17 : vector<8x384xf32>
    %19 = math.exp %18 : vector<8x384xf32>
    %cst_14 = arith.constant 1.000000e+00 : f32
    %20 = vector.broadcast %cst_14 : f32 to vector<8x384xf32>
    %21 = arith.addf %20, %19 : vector<8x384xf32>
    %22 = arith.divf %20, %21 : vector<8x384xf32>
    %23 = vector.extract_strided_slice %16 {offsets = [0, 384], sizes = [8, 128], strides = [1, 1]} : vector<8x512xf32> to vector<8x128xf32>
    %24 = math.tanh %23 : vector<8x128xf32>
    %25 = vector.extract_strided_slice %22 {offsets = [0, 0], sizes = [8, 128], strides = [1, 1]} : vector<8x384xf32> to vector<8x128xf32>
    %26 = vector.extract_strided_slice %22 {offsets = [0, 128], sizes = [8, 128], strides = [1, 1]} : vector<8x384xf32> to vector<8x128xf32>
    %27 = vector.extract_strided_slice %22 {offsets = [0, 256], sizes = [8, 128], strides = [1, 1]} : vector<8x384xf32> to vector<8x128xf32>
    %28 = arith.mulf %26, %9 : vector<8x128xf32>
    %29 = arith.mulf %25, %24 : vector<8x128xf32>
    %30 = arith.addf %28, %29 : vector<8x128xf32>
    %31 = math.tanh %30 : vector<8x128xf32>
    %32 = arith.mulf %27, %31 : vector<8x128xf32>
    %c1_i32 = arith.constant 1 : i32
    %c8_i32_15 = arith.constant 8 : i32
    %33 = arith.muli %c1_i32, %c8_i32_15 : i32
    %34 = tpu.assume_multiple %33, 8 : i32
    %35 = arith.index_cast %34 : i32 to index
    %c0_16 = arith.constant 0 : index
    %36 = vector.load %arg8[%35, %c0_16] : memref<64x512xf32, #tpu.memory_space<vmem>>, vector<8x512xf32>
    %c0_17 = arith.constant 0 : index
    %c0_18 = arith.constant 0 : index
    %37 = vector.load %arg3[%c0_17, %c0_18] : memref<128x512xf32, #tpu.memory_space<vmem>>, vector<128x512xf32>
    %cst_19 = arith.constant dense<0.000000e+00> : vector<8x512xf32>
    %38 = tpu.matmul %32, %37, %cst_19 {dimension_numbers = #tpu.dot_dimension_numbers<[1], [0], [0], [1], [0, 0, 1, 1], [], []>} : vector<8x128xf32>, vector<128x512xf32>, vector<8x512xf32> -> vector<8x512xf32>
    %39 = arith.addf %36, %38 : vector<8x512xf32>
    %40 = vector.extract_strided_slice %39 {offsets = [0, 0], sizes = [8, 384], strides = [1, 1]} : vector<8x512xf32> to vector<8x384xf32>
    %41 = arith.negf %40 : vector<8x384xf32>
    %42 = math.exp %41 : vector<8x384xf32>
    %cst_20 = arith.constant 1.000000e+00 : f32
    %43 = vector.broadcast %cst_20 : f32 to vector<8x384xf32>
    %44 = arith.addf %43, %42 : vector<8x384xf32>
    %45 = arith.divf %43, %44 : vector<8x384xf32>
    %46 = vector.extract_strided_slice %39 {offsets = [0, 384], sizes = [8, 128], strides = [1, 1]} : vector<8x512xf32> to vector<8x128xf32>
    %47 = math.tanh %46 : vector<8x128xf32>
    %48 = vector.extract_strided_slice %45 {offsets = [0, 0], sizes = [8, 128], strides = [1, 1]} : vector<8x384xf32> to vector<8x128xf32>
    %49 = vector.extract_strided_slice %45 {offsets = [0, 128], sizes = [8, 128], strides = [1, 1]} : vector<8x384xf32> to vector<8x128xf32>
    %50 = vector.extract_strided_slice %45 {offsets = [0, 256], sizes = [8, 128], strides = [1, 1]} : vector<8x384xf32> to vector<8x128xf32>
    %51 = arith.mulf %49, %30 : vector<8x128xf32>
    %52 = arith.mulf %48, %47 : vector<8x128xf32>
    %53 = arith.addf %51, %52 : vector<8x128xf32>
    %54 = math.tanh %53 : vector<8x128xf32>
    %55 = arith.mulf %50, %54 : vector<8x128xf32>
    %c2_i32 = arith.constant 2 : i32
    %c8_i32_21 = arith.constant 8 : i32
    %56 = arith.muli %c2_i32, %c8_i32_21 : i32
    %57 = tpu.assume_multiple %56, 8 : i32
    %58 = arith.index_cast %57 : i32 to index
    %c0_22 = arith.constant 0 : index
    %59 = vector.load %arg8[%58, %c0_22] : memref<64x512xf32, #tpu.memory_space<vmem>>, vector<8x512xf32>
    %c0_23 = arith.constant 0 : index
    %c0_24 = arith.constant 0 : index
    %60 = vector.load %arg3[%c0_23, %c0_24] : memref<128x512xf32, #tpu.memory_space<vmem>>, vector<128x512xf32>
    %cst_25 = arith.constant dense<0.000000e+00> : vector<8x512xf32>
    %61 = tpu.matmul %55, %60, %cst_25 {dimension_numbers = #tpu.dot_dimension_numbers<[1], [0], [0], [1], [0, 0, 1, 1], [], []>} : vector<8x128xf32>, vector<128x512xf32>, vector<8x512xf32> -> vector<8x512xf32>
    %62 = arith.addf %59, %61 : vector<8x512xf32>
    %63 = vector.extract_strided_slice %62 {offsets = [0, 0], sizes = [8, 384], strides = [1, 1]} : vector<8x512xf32> to vector<8x384xf32>
    %64 = arith.negf %63 : vector<8x384xf32>
    %65 = math.exp %64 : vector<8x384xf32>
    %cst_26 = arith.constant 1.000000e+00 : f32
    %66 = vector.broadcast %cst_26 : f32 to vector<8x384xf32>
    %67 = arith.addf %66, %65 : vector<8x384xf32>
    %68 = arith.divf %66, %67 : vector<8x384xf32>
    %69 = vector.extract_strided_slice %62 {offsets = [0, 384], sizes = [8, 128], strides = [1, 1]} : vector<8x512xf32> to vector<8x128xf32>
    %70 = math.tanh %69 : vector<8x128xf32>
    %71 = vector.extract_strided_slice %68 {offsets = [0, 0], sizes = [8, 128], strides = [1, 1]} : vector<8x384xf32> to vector<8x128xf32>
    %72 = vector.extract_strided_slice %68 {offsets = [0, 128], sizes = [8, 128], strides = [1, 1]} : vector<8x384xf32> to vector<8x128xf32>
    %73 = vector.extract_strided_slice %68 {offsets = [0, 256], sizes = [8, 128], strides = [1, 1]} : vector<8x384xf32> to vector<8x128xf32>
    %74 = arith.mulf %72, %53 : vector<8x128xf32>
    %75 = arith.mulf %71, %70 : vector<8x128xf32>
    %76 = arith.addf %74, %75 : vector<8x128xf32>
    %77 = math.tanh %76 : vector<8x128xf32>
    %78 = arith.mulf %73, %77 : vector<8x128xf32>
    %c3_i32 = arith.constant 3 : i32
    %c8_i32_27 = arith.constant 8 : i32
    %79 = arith.muli %c3_i32, %c8_i32_27 : i32
    %80 = tpu.assume_multiple %79, 8 : i32
    %81 = arith.index_cast %80 : i32 to index
    %c0_28 = arith.constant 0 : index
    %82 = vector.load %arg8[%81, %c0_28] : memref<64x512xf32, #tpu.memory_space<vmem>>, vector<8x512xf32>
    %c0_29 = arith.constant 0 : index
    %c0_30 = arith.constant 0 : index
    %83 = vector.load %arg3[%c0_29, %c0_30] : memref<128x512xf32, #tpu.memory_space<vmem>>, vector<128x512xf32>
    %cst_31 = arith.constant dense<0.000000e+00> : vector<8x512xf32>
    %84 = tpu.matmul %78, %83, %cst_31 {dimension_numbers = #tpu.dot_dimension_numbers<[1], [0], [0], [1], [0, 0, 1, 1], [], []>} : vector<8x128xf32>, vector<128x512xf32>, vector<8x512xf32> -> vector<8x512xf32>
    %85 = arith.addf %82, %84 : vector<8x512xf32>
    %86 = vector.extract_strided_slice %85 {offsets = [0, 0], sizes = [8, 384], strides = [1, 1]} : vector<8x512xf32> to vector<8x384xf32>
    %87 = arith.negf %86 : vector<8x384xf32>
    %88 = math.exp %87 : vector<8x384xf32>
    %cst_32 = arith.constant 1.000000e+00 : f32
    %89 = vector.broadcast %cst_32 : f32 to vector<8x384xf32>
    %90 = arith.addf %89, %88 : vector<8x384xf32>
    %91 = arith.divf %89, %90 : vector<8x384xf32>
    %92 = vector.extract_strided_slice %85 {offsets = [0, 384], sizes = [8, 128], strides = [1, 1]} : vector<8x512xf32> to vector<8x128xf32>
    %93 = math.tanh %92 : vector<8x128xf32>
    %94 = vector.extract_strided_slice %91 {offsets = [0, 0], sizes = [8, 128], strides = [1, 1]} : vector<8x384xf32> to vector<8x128xf32>
    %95 = vector.extract_strided_slice %91 {offsets = [0, 128], sizes = [8, 128], strides = [1, 1]} : vector<8x384xf32> to vector<8x128xf32>
    %96 = vector.extract_strided_slice %91 {offsets = [0, 256], sizes = [8, 128], strides = [1, 1]} : vector<8x384xf32> to vector<8x128xf32>
    %97 = arith.mulf %95, %76 : vector<8x128xf32>
    %98 = arith.mulf %94, %93 : vector<8x128xf32>
    %99 = arith.addf %97, %98 : vector<8x128xf32>
    %100 = math.tanh %99 : vector<8x128xf32>
    %101 = arith.mulf %96, %100 : vector<8x128xf32>
    %c4_i32 = arith.constant 4 : i32
    %c8_i32_33 = arith.constant 8 : i32
    %102 = arith.muli %c4_i32, %c8_i32_33 : i32
    %103 = tpu.assume_multiple %102, 8 : i32
    %104 = arith.index_cast %103 : i32 to index
    %c0_34 = arith.constant 0 : index
    %105 = vector.load %arg8[%104, %c0_34] : memref<64x512xf32, #tpu.memory_space<vmem>>, vector<8x512xf32>
    %c0_35 = arith.constant 0 : index
    %c0_36 = arith.constant 0 : index
    %106 = vector.load %arg3[%c0_35, %c0_36] : memref<128x512xf32, #tpu.memory_space<vmem>>, vector<128x512xf32>
    %cst_37 = arith.constant dense<0.000000e+00> : vector<8x512xf32>
    %107 = tpu.matmul %101, %106, %cst_37 {dimension_numbers = #tpu.dot_dimension_numbers<[1], [0], [0], [1], [0, 0, 1, 1], [], []>} : vector<8x128xf32>, vector<128x512xf32>, vector<8x512xf32> -> vector<8x512xf32>
    %108 = arith.addf %105, %107 : vector<8x512xf32>
    %109 = vector.extract_strided_slice %108 {offsets = [0, 0], sizes = [8, 384], strides = [1, 1]} : vector<8x512xf32> to vector<8x384xf32>
    %110 = arith.negf %109 : vector<8x384xf32>
    %111 = math.exp %110 : vector<8x384xf32>
    %cst_38 = arith.constant 1.000000e+00 : f32
    %112 = vector.broadcast %cst_38 : f32 to vector<8x384xf32>
    %113 = arith.addf %112, %111 : vector<8x384xf32>
    %114 = arith.divf %112, %113 : vector<8x384xf32>
    %115 = vector.extract_strided_slice %108 {offsets = [0, 384], sizes = [8, 128], strides = [1, 1]} : vector<8x512xf32> to vector<8x128xf32>
    %116 = math.tanh %115 : vector<8x128xf32>
    %117 = vector.extract_strided_slice %114 {offsets = [0, 0], sizes = [8, 128], strides = [1, 1]} : vector<8x384xf32> to vector<8x128xf32>
    %118 = vector.extract_strided_slice %114 {offsets = [0, 128], sizes = [8, 128], strides = [1, 1]} : vector<8x384xf32> to vector<8x128xf32>
    %119 = vector.extract_strided_slice %114 {offsets = [0, 256], sizes = [8, 128], strides = [1, 1]} : vector<8x384xf32> to vector<8x128xf32>
    %120 = arith.mulf %118, %99 : vector<8x128xf32>
    %121 = arith.mulf %117, %116 : vector<8x128xf32>
    %122 = arith.addf %120, %121 : vector<8x128xf32>
    %123 = math.tanh %122 : vector<8x128xf32>
    %124 = arith.mulf %119, %123 : vector<8x128xf32>
    %c5_i32 = arith.constant 5 : i32
    %c8_i32_39 = arith.constant 8 : i32
    %125 = arith.muli %c5_i32, %c8_i32_39 : i32
    %126 = tpu.assume_multiple %125, 8 : i32
    %127 = arith.index_cast %126 : i32 to index
    %c0_40 = arith.constant 0 : index
    %128 = vector.load %arg8[%127, %c0_40] : memref<64x512xf32, #tpu.memory_space<vmem>>, vector<8x512xf32>
    %c0_41 = arith.constant 0 : index
    %c0_42 = arith.constant 0 : index
    %129 = vector.load %arg3[%c0_41, %c0_42] : memref<128x512xf32, #tpu.memory_space<vmem>>, vector<128x512xf32>
    %cst_43 = arith.constant dense<0.000000e+00> : vector<8x512xf32>
    %130 = tpu.matmul %124, %129, %cst_43 {dimension_numbers = #tpu.dot_dimension_numbers<[1], [0], [0], [1], [0, 0, 1, 1], [], []>} : vector<8x128xf32>, vector<128x512xf32>, vector<8x512xf32> -> vector<8x512xf32>
    %131 = arith.addf %128, %130 : vector<8x512xf32>
    %132 = vector.extract_strided_slice %131 {offsets = [0, 0], sizes = [8, 384], strides = [1, 1]} : vector<8x512xf32> to vector<8x384xf32>
    %133 = arith.negf %132 : vector<8x384xf32>
    %134 = math.exp %133 : vector<8x384xf32>
    %cst_44 = arith.constant 1.000000e+00 : f32
    %135 = vector.broadcast %cst_44 : f32 to vector<8x384xf32>
    %136 = arith.addf %135, %134 : vector<8x384xf32>
    %137 = arith.divf %135, %136 : vector<8x384xf32>
    %138 = vector.extract_strided_slice %131 {offsets = [0, 384], sizes = [8, 128], strides = [1, 1]} : vector<8x512xf32> to vector<8x128xf32>
    %139 = math.tanh %138 : vector<8x128xf32>
    %140 = vector.extract_strided_slice %137 {offsets = [0, 0], sizes = [8, 128], strides = [1, 1]} : vector<8x384xf32> to vector<8x128xf32>
    %141 = vector.extract_strided_slice %137 {offsets = [0, 128], sizes = [8, 128], strides = [1, 1]} : vector<8x384xf32> to vector<8x128xf32>
    %142 = vector.extract_strided_slice %137 {offsets = [0, 256], sizes = [8, 128], strides = [1, 1]} : vector<8x384xf32> to vector<8x128xf32>
    %143 = arith.mulf %141, %122 : vector<8x128xf32>
    %144 = arith.mulf %140, %139 : vector<8x128xf32>
    %145 = arith.addf %143, %144 : vector<8x128xf32>
    %146 = math.tanh %145 : vector<8x128xf32>
    %147 = arith.mulf %142, %146 : vector<8x128xf32>
    %c6_i32 = arith.constant 6 : i32
    %c8_i32_45 = arith.constant 8 : i32
    %148 = arith.muli %c6_i32, %c8_i32_45 : i32
    %149 = tpu.assume_multiple %148, 8 : i32
    %150 = arith.index_cast %149 : i32 to index
    %c0_46 = arith.constant 0 : index
    %151 = vector.load %arg8[%150, %c0_46] : memref<64x512xf32, #tpu.memory_space<vmem>>, vector<8x512xf32>
    %c0_47 = arith.constant 0 : index
    %c0_48 = arith.constant 0 : index
    %152 = vector.load %arg3[%c0_47, %c0_48] : memref<128x512xf32, #tpu.memory_space<vmem>>, vector<128x512xf32>
    %cst_49 = arith.constant dense<0.000000e+00> : vector<8x512xf32>
    %153 = tpu.matmul %147, %152, %cst_49 {dimension_numbers = #tpu.dot_dimension_numbers<[1], [0], [0], [1], [0, 0, 1, 1], [], []>} : vector<8x128xf32>, vector<128x512xf32>, vector<8x512xf32> -> vector<8x512xf32>
    %154 = arith.addf %151, %153 : vector<8x512xf32>
    %155 = vector.extract_strided_slice %154 {offsets = [0, 0], sizes = [8, 384], strides = [1, 1]} : vector<8x512xf32> to vector<8x384xf32>
    %156 = arith.negf %155 : vector<8x384xf32>
    %157 = math.exp %156 : vector<8x384xf32>
    %cst_50 = arith.constant 1.000000e+00 : f32
    %158 = vector.broadcast %cst_50 : f32 to vector<8x384xf32>
    %159 = arith.addf %158, %157 : vector<8x384xf32>
    %160 = arith.divf %158, %159 : vector<8x384xf32>
    %161 = vector.extract_strided_slice %154 {offsets = [0, 384], sizes = [8, 128], strides = [1, 1]} : vector<8x512xf32> to vector<8x128xf32>
    %162 = math.tanh %161 : vector<8x128xf32>
    %163 = vector.extract_strided_slice %160 {offsets = [0, 0], sizes = [8, 128], strides = [1, 1]} : vector<8x384xf32> to vector<8x128xf32>
    %164 = vector.extract_strided_slice %160 {offsets = [0, 128], sizes = [8, 128], strides = [1, 1]} : vector<8x384xf32> to vector<8x128xf32>
    %165 = vector.extract_strided_slice %160 {offsets = [0, 256], sizes = [8, 128], strides = [1, 1]} : vector<8x384xf32> to vector<8x128xf32>
    %166 = arith.mulf %164, %145 : vector<8x128xf32>
    %167 = arith.mulf %163, %162 : vector<8x128xf32>
    %168 = arith.addf %166, %167 : vector<8x128xf32>
    %169 = math.tanh %168 : vector<8x128xf32>
    %170 = arith.mulf %165, %169 : vector<8x128xf32>
    %c7_i32 = arith.constant 7 : i32
    %c8_i32_51 = arith.constant 8 : i32
    %171 = arith.muli %c7_i32, %c8_i32_51 : i32
    %172 = tpu.assume_multiple %171, 8 : i32
    %173 = arith.index_cast %172 : i32 to index
    %c0_52 = arith.constant 0 : index
    %174 = vector.load %arg8[%173, %c0_52] : memref<64x512xf32, #tpu.memory_space<vmem>>, vector<8x512xf32>
    %c0_53 = arith.constant 0 : index
    %c0_54 = arith.constant 0 : index
    %175 = vector.load %arg3[%c0_53, %c0_54] : memref<128x512xf32, #tpu.memory_space<vmem>>, vector<128x512xf32>
    %cst_55 = arith.constant dense<0.000000e+00> : vector<8x512xf32>
    %176 = tpu.matmul %170, %175, %cst_55 {dimension_numbers = #tpu.dot_dimension_numbers<[1], [0], [0], [1], [0, 0, 1, 1], [], []>} : vector<8x128xf32>, vector<128x512xf32>, vector<8x512xf32> -> vector<8x512xf32>
    %177 = arith.addf %174, %176 : vector<8x512xf32>
    %178 = vector.extract_strided_slice %177 {offsets = [0, 0], sizes = [8, 384], strides = [1, 1]} : vector<8x512xf32> to vector<8x384xf32>
    %179 = arith.negf %178 : vector<8x384xf32>
    %180 = math.exp %179 : vector<8x384xf32>
    %cst_56 = arith.constant 1.000000e+00 : f32
    %181 = vector.broadcast %cst_56 : f32 to vector<8x384xf32>
    %182 = arith.addf %181, %180 : vector<8x384xf32>
    %183 = arith.divf %181, %182 : vector<8x384xf32>
    %184 = vector.extract_strided_slice %177 {offsets = [0, 384], sizes = [8, 128], strides = [1, 1]} : vector<8x512xf32> to vector<8x128xf32>
    %185 = math.tanh %184 : vector<8x128xf32>
    %186 = vector.extract_strided_slice %183 {offsets = [0, 0], sizes = [8, 128], strides = [1, 1]} : vector<8x384xf32> to vector<8x128xf32>
    %187 = vector.extract_strided_slice %183 {offsets = [0, 128], sizes = [8, 128], strides = [1, 1]} : vector<8x384xf32> to vector<8x128xf32>
    %188 = vector.extract_strided_slice %183 {offsets = [0, 256], sizes = [8, 128], strides = [1, 1]} : vector<8x384xf32> to vector<8x128xf32>
    %189 = arith.mulf %187, %168 : vector<8x128xf32>
    %190 = arith.mulf %186, %185 : vector<8x128xf32>
    %191 = arith.addf %189, %190 : vector<8x128xf32>
    %192 = math.tanh %191 : vector<8x128xf32>
    %193 = arith.mulf %188, %192 : vector<8x128xf32>
    %c8_i32_57 = arith.constant 8 : i32
    %c0_58 = arith.constant 0 : index
    %c0_59 = arith.constant 0 : index
    %194 = vector.load %arg5[%c0_58, %c0_59] : memref<128x3xf32, #tpu.memory_space<vmem>>, vector<128x3xf32>
    %cst_60 = arith.constant dense<0.000000e+00> : vector<8x3xf32>
    %195 = tpu.matmul %193, %194, %cst_60 {dimension_numbers = #tpu.dot_dimension_numbers<[1], [0], [0], [1], [0, 0, 1, 1], [], []>} : vector<8x128xf32>, vector<128x3xf32>, vector<8x3xf32> -> vector<8x3xf32>
    %c0_61 = arith.constant 0 : index
    %c0_62 = arith.constant 0 : index
    %196 = vector.load %arg6[%c0_61, %c0_62] : memref<1x3xf32, #tpu.memory_space<vmem>>, vector<1x3xf32>
    %197 = vector.broadcast %196 : vector<1x3xf32> to vector<8x3xf32>
    %198 = arith.addf %195, %197 : vector<8x3xf32>
    %c0_63 = arith.constant 0 : index
    %c0_64 = arith.constant 0 : index
    %c0_65 = arith.constant 0 : index
    %199 = vector.load %arg7[%c0_63, %c0_64, %c0_65] : memref<1x8x3xf32, #tpu.memory_space<vmem>>, vector<1x8x3xf32>
    %200 = vector.shape_cast %199 : vector<1x8x3xf32> to vector<8x3xf32>
    %201 = vector.shape_cast %198 : vector<8x3xf32> to vector<1x8x3xf32>
    tpu.vector_store %arg7[%c0_63, %c0_64, %c0_65], %201 {strides = array<i32>} : memref<1x8x3xf32, #tpu.memory_space<vmem>>, vector<1x8x3xf32>,
    return
  }
  func.func @transform_0(%arg0: i32) -> (i32, i32, i32) {
    %c0_i32 = arith.constant 0 : i32
    %c0_i32_0 = arith.constant 0 : i32
    %c0_i32_1 = arith.constant 0 : i32
    return %arg0, %c0_i32, %c0_i32_0 : i32, i32, i32
  }
  func.func @transform_1(%arg0: i32) -> (i32, i32) {
    %c0_i32 = arith.constant 0 : i32
    %c0_i32_0 = arith.constant 0 : i32
    %c0_i32_1 = arith.constant 0 : i32
    return %c0_i32, %c0_i32_0 : i32, i32
  }
  func.func @transform_2(%arg0: i32) -> (i32, i32) {
    %c0_i32 = arith.constant 0 : i32
    %c0_i32_0 = arith.constant 0 : i32
    %c0_i32_1 = arith.constant 0 : i32
    return %c0_i32, %c0_i32_0 : i32, i32
  }
  func.func @transform_3(%arg0: i32) -> (i32, i32) {
    %c0_i32 = arith.constant 0 : i32
    %c0_i32_0 = arith.constant 0 : i32
    %c0_i32_1 = arith.constant 0 : i32
    return %c0_i32, %c0_i32_0 : i32, i32
  }
  func.func @transform_4(%arg0: i32) -> (i32, i32) {
    %c0_i32 = arith.constant 0 : i32
    %c0_i32_0 = arith.constant 0 : i32
    %c0_i32_1 = arith.constant 0 : i32
    return %c0_i32, %c0_i32_0 : i32, i32
  }
  func.func @transform_5(%arg0: i32) -> (i32, i32) {
    %c0_i32 = arith.constant 0 : i32
    %c0_i32_0 = arith.constant 0 : i32
    %c0_i32_1 = arith.constant 0 : i32
    return %c0_i32, %c0_i32_0 : i32, i32
  }
  func.func @transform_6(%arg0: i32) -> (i32, i32, i32) {
    %c0_i32 = arith.constant 0 : i32
    %c0_i32_0 = arith.constant 0 : i32
    %c0_i32_1 = arith.constant 0 : i32
    return %arg0, %c0_i32, %c0_i32_0 : i32, i32, i32
  }
}

</mosaic_0001>

<bundles_post_ra>
// kernel: tpu_custom_call.1
= control target key start
LH: loop header
LB: loop body
LE: loop exit
PB: predicated region body
PF: predicated region fallthrough
CT: control target
= control target key end

     0   :  { %11 = vsyncpa [#allocation4], 0  ;;  %s2808_s21 = smov [#allocation3]   ;;  %s3392_s0 = inlined_call_operand.vmem [shape: f32[1,64,3], index: 0, kind: input, shape index: {}]   ;;  %s3393_s1 = inlined_call_operand.vmem [shape: f32[3,512], index: 1, kind: input, shape index: {}]   ;;  %s3394_s2 = inlined_call_operand.hbm [shape: f32[128,512], index: 2, kind: input, shape index: {}]   ;;  %s3395_s3 = inlined_call_operand.vmem [shape: f32[1,512], index: 3, kind: input, shape index: {}]   ;;  %s3396_s4 = inlined_call_operand.vmem [shape: f32[128,3], index: 4, kind: input, shape index: {}]   ;;  %s3397_s5 = inlined_call_operand.vmem [shape: f32[1,3], index: 5, kind: input, shape index: {}]   ;;  %s3398_s6 = inlined_call_operand.vmem [shape: f32[1,8,3], index: 6, kind: output, shape index: {}]  }
   0x1   :  { %s21_s22 = sshll.u32 %s2808_s21, 4  ;;  %s2784_s25 = scalar_lea.hbm %s3394_s2, 8192  ;;  %s22_s22 = int_to_ptr.vmem [resolvable:$true] %s21_s22 }
   0x2   :  { %p2785_p0 = scmp.ne.s32.totalorder %s3394_s2, %s2784_s25  ;;  %p2788_p1 = scmp.lt.u32.totalorder %s2784_s25, %s3394_s2 }
   0x4   :  { %p2790_p2 = pnand %p2788_p1, %p2785_p0 }
   0x6   :  { %2793 = shalt.err (!%p2790_p2)
}
   0x7   :  { %s2794_s30 = scalar_lea.vmem %s22_s22, 8192  ;;  %p2799_p4 = scmp.lt.s32.totalorder %s22_s22, %s22_s22 }
   0x8   :  { %p2795_p3 = scmp.ne.s32.totalorder %s22_s22, %s2794_s30  ;;  %p2800_p5 = scmp.lt.s32.totalorder %s2794_s30, %s2794_s30 }
   0xa   :  { %p2801_p6 = por %p2800_p5, %p2799_p4 }
   0xc   :  { %p2802_p7 = pnand %p2801_p6, %p2795_p3 }
   0xe   :  { %2805 = shalt.err (!%p2802_p7)
}
   0xf   :  { %s2809_s7 = smov 512   ;;  %s2810_s8 = smov 32  }
  0x10   :  { %27 = dma.hbm_to_vmem [thread:$0]  %s3394_s2, 8192, %s22_s22, [#allocation4], %s2809_s7, %s2809_s7, %s2810_s8  }
  0x11   :  { %2806 = dma.done.wait [#allocation4], 8192  }
  0x12   :  { %2807 = vsyncadd [#allocation4], 4294959104  ;;  %v2811_v0 = vmov 0.0   ;;  %v45_v1 = vld [vmem:[%s3393_s1] sm:$0x77]  ;;  %vm98_vm0 = vcmask 1042432  }
  0x13   :  { %171 = vmatprep.mubr.f32.mxu0 %v2811_v0  ;;  %284 = vmatprep.mubr.f32.mxu1 %v2811_v0  ;;  %v46_v2 = vld [vmem:[%s3393_s1 + $0x8] sm:$0x77]  ;;  %v37_v3 = vld [vmem:[%s3392_s0] sm:$0xff]  ;;  %v71_v4 = vcombine.high %v45_v1, %v45_v1  ;;  %v375_v8 = vld [vmem:[#allocation3 + $0x18] sm:$0xff]  ;;  %vm73_vm1 = vcmask 23552   ;;  %vm2813_vm2 = vmmov 0  }
  0x14   :  { %v72_v5 = vcombine.high %v46_v2, %v46_v2  ;;  %v373_v6 = vld [vmem:[#allocation3 + $0x8] sm:$0xff]  ;;  %v379_v10 = vld [vmem:[#allocation3 + $0x38] sm:$0xff]  ;;  %v372_v11 = vld [vmem:[#allocation3] sm:$0xff] }
  0x15   :  { %v377_v7 = vld [vmem:[#allocation3 + $0x28] sm:$0xff]  ;;  %v376_v12 = vld [vmem:[#allocation3 + $0x20] sm:$0xff]  ;;  %1951 = vmatprep.subr.msk.mxu0 %vm98_vm0, %v71_v4  ;;  %v2876_v13 = vpack.c.bf16 %v379_v10, %v375_v8  ;;  %v374_v15 = vld [vmem:[#allocation3 + $0x10] sm:$0xff] }
  0x16   :  { %v2872_v9 = vpack.c.bf16 %v377_v7, %v373_v6  ;;  %1961 = vmatprep.subr.msk.mxu1 %vm98_vm0, %v72_v5  ;;  %v2878_v14 = vpack.c.bf16 %v376_v12, %v372_v11  ;;  %v378_v16 = vld [vmem:[#allocation3 + $0x30] sm:$0xff]  ;;  %1952 = vmatpush1.msk.msra.mxu0 %vm98_vm0, %v45_v1  ;;  %v381_v18 = vld [vmem:[#allocation3 + $0x48] sm:$0xff]  ;;  %v383_v20 = vld [vmem:[#allocation3 + $0x58] sm:$0xff] }
  0x17   :  { %1962 = vmatpush1.msk.msra.mxu1 %vm98_vm0, %v46_v2  ;;  %v2882_v17 = vpack.c.bf16 %v378_v16, %v374_v15  ;;  %v385_v19 = vld [vmem:[#allocation3 + $0x68] sm:$0xff]  ;;  %1953 = vmatmul.mubr.msk.f32.vlgmr.msra.gmra.mrb[0].mxu0 %vm73_vm1, %v37_v3  ;;  %v387_v21 = vld [vmem:[#allocation3 + $0x78] sm:$0xff]  ;;  %v380_v22 = vld [vmem:[#allocation3 + $0x40] sm:$0xff] }
  0x18   :  { %1963 = vmatmul.mubr.msk.f32.vlgmr.msra.gmra.mrb[0].mxu1 %vm73_vm1, %v37_v3  ;;  %v384_v23 = vld [vmem:[#allocation3 + $0x60] sm:$0xff]  ;;  %2049 = vmatprep.subr.bf16.mxu0 %v2872_v9  ;;  %v38_v24 = vld [vmem:[%s3392_s0 + $0x8] sm:$0xff]  ;;  %v2891_v25 = vpack.c.bf16 %v385_v19, %v381_v18  ;;  %v2893_v26 = vpack.c.bf16 %v387_v21, %v383_v20  ;;  %v382_v27 = vld [vmem:[#allocation3 + $0x50] sm:$0xff] }
  0x19   :  { %2081 = vmatprep.subr.bf16.mxu1 %v2876_v13  ;;  %v386_v28 = vld [vmem:[#allocation3 + $0x70] sm:$0xff]  ;;  %2051 = vmatpush1.bf16.msra.mxu0 %v2878_v14  ;;  %v2897_v29 = vpack.c.bf16 %v384_v23, %v380_v22  ;;  %v389_v31 = vld [vmem:[#allocation3 + $0x88] sm:$0xff]  ;;  %v391_v33 = vld [vmem:[#allocation3 + $0x98] sm:$0xff] }
  0x1a   :  { %2083 = vmatpush1.bf16.msra.mxu1 %v2882_v17  ;;  %v2899_v30 = vpack.c.bf16 %v386_v28, %v382_v27  ;;  %v393_v32 = vld [vmem:[#allocation3 + $0xa8] sm:$0xff]  ;;  %177 = vmatprep.mubr.f32.mxu0 %v2811_v0  ;;  %v395_v34 = vld [vmem:[#allocation3 + $0xb8] sm:$0xff]  ;;  %v388_v35 = vld [vmem:[#allocation3 + $0x80] sm:$0xff] }
  0x1b   :  { %290 = vmatprep.mubr.f32.mxu1 %v2811_v0  ;;  %v392_v36 = vld [vmem:[#allocation3 + $0xa0] sm:$0xff]  ;;  %1954 = vmatmul.mubr.msk.f32.gmra.mrb[2].mxu0 %vm73_vm1, %v38_v24  ;;  %v390_v37 = vld [vmem:[#allocation3 + $0x90] sm:$0xff]  ;;  %v2910_v40 = vpack.c.bf16 %v393_v32, %v389_v31  ;;  %v2912_v41 = vpack.c.bf16 %v395_v34, %v391_v33  ;;  %v397_v42 = vld [vmem:[#allocation3 + $0xc8] sm:$0xff] }
  0x1c   :  { %1964 = vmatmul.mubr.msk.f32.gmra.mrb[2].mxu1 %vm73_vm1, %v38_v24  ;;  %v394_v38 = vld [vmem:[#allocation3 + $0xb0] sm:$0xff]  ;;  %2053 = vmatprep.subr.bf16.mxu0 %v2891_v25  ;;  %v401_v43 = vld [vmem:[#allocation3 + $0xe8] sm:$0xff]  ;;  %v2916_v44 = vpack.c.bf16 %v392_v36, %v388_v35  ;;  %v399_v46 = vld [vmem:[#allocation3 + $0xd8] sm:$0xff] }
  0x1d   :  { %2085 = vmatprep.subr.bf16.mxu1 %v2893_v26  ;;  %v39_v39 = vld [vmem:[%s3392_s0 + $0x10] sm:$0xff]  ;;  %2055 = vmatpush1.bf16.msra.mxu0 %v2897_v29  ;;  %v2918_v45 = vpack.c.bf16 %v394_v38, %v390_v37  ;;  %v403_v47 = vld [vmem:[#allocation3 + $0xf8] sm:$0xff]  ;;  %v396_v48 = vld [vmem:[#allocation3 + $0xc0] sm:$0xff]  ;;  %v2929_v53 = vpack.c.bf16 %v401_v43, %v397_v42 }
  0x1e   :  { %2087 = vmatpush1.bf16.msra.mxu1 %v2899_v30  ;;  %183 = vmatprep.mubr.f32.mxu0 %v2811_v0  ;;  %v400_v49 = vld [vmem:[#allocation3 + $0xe0] sm:$0xff]  ;;  %v398_v50 = vld [vmem:[#allocation3 + $0xd0] sm:$0xff]  ;;  %v40_v52 = vld [vmem:[%s3392_s0 + $0x18] sm:$0xff]  ;;  %v2931_v54 = vpack.c.bf16 %v403_v47, %v399_v46 }
  0x1f   :  { %296 = vmatprep.mubr.f32.mxu1 %v2811_v0  ;;  %v402_v51 = vld [vmem:[#allocation3 + $0xf0] sm:$0xff]  ;;  %1955 = vmatmul.mubr.msk.f32.gmra.mrb[4].mxu0 %vm73_vm1, %v39_v39  ;;  %v405_v55 = vld [vmem:[#allocation3 + $0x108] sm:$0xff]  ;;  %v2935_v57 = vpack.c.bf16 %v400_v49, %v396_v48  ;;  %v407_v59 = vld [vmem:[#allocation3 + $0x118] sm:$0xff] }
  0x20   :  { %1965 = vmatmul.mubr.msk.f32.gmra.mrb[4].mxu1 %vm73_vm1, %v39_v39  ;;  %2057 = vmatprep.subr.bf16.mxu0 %v2910_v40  ;;  %v409_v56 = vld [vmem:[#allocation3 + $0x128] sm:$0xff]  ;;  %v2937_v58 = vpack.c.bf16 %v402_v51, %v398_v50  ;;  %v411_v60 = vld [vmem:[#allocation3 + $0x138] sm:$0xff]  ;;  %v404_v61 = vld [vmem:[#allocation3 + $0x100] sm:$0xff] }
  0x21   :  { %2089 = vmatprep.subr.bf16.mxu1 %v2912_v41  ;;  %2059 = vmatpush1.bf16.msra.mxu0 %v2916_v44  ;;  %v408_v62 = vld [vmem:[#allocation3 + $0x120] sm:$0xff]  ;;  %v406_v63 = vld [vmem:[#allocation3 + $0x110] sm:$0xff]  ;;  %v2948_v3 = vpack.c.bf16 %v409_v56, %v405_v55  ;;  %v2950_v4 = vpack.c.bf16 %v411_v60, %v407_v59  ;;  %v413_v5 = vld [vmem:[#allocation3 + $0x148] sm:$0xff] }
  0x22   :  { %2091 = vmatpush1.bf16.msra.mxu1 %v2918_v45  ;;  %189 = vmatprep.mubr.f32.mxu0 %v2811_v0  ;;  %v410_v1 = vld [vmem:[#allocation3 + $0x130] sm:$0xff]  ;;  %v41_v2 = vld [vmem:[%s3392_s0 + $0x20] sm:$0xff]  ;;  %v417_v6 = vld [vmem:[#allocation3 + $0x168] sm:$0xff]  ;;  %v2954_v7 = vpack.c.bf16 %v408_v62, %v404_v61  ;;  %v49_v62 = vlaneseq }
  0x23   :  { %302 = vmatprep.mubr.f32.mxu1 %v2811_v0  ;;  %1956 = vmatmul.mubr.msk.f32.gmra.mrb[6].mxu0 %vm73_vm1, %v40_v52  ;;  %v2956_v8 = vpack.c.bf16 %v410_v1, %v406_v63  ;;  %v415_v10 = vld [vmem:[#allocation3 + $0x158] sm:$0xff]  ;;  %v412_v12 = vld [vmem:[#allocation3 + $0x140] sm:$0xff]  ;;  %v414_v16 = vld [vmem:[#allocation3 + $0x150] sm:$0xff]  ;;  %v2967_v20 = vpack.c.bf16 %v417_v6, %v413_v5 }
  0x24   :  { %1966 = vmatmul.mubr.msk.f32.gmra.mrb[6].mxu1 %vm73_vm1, %v40_v52  ;;  %2061 = vmatprep.subr.bf16.mxu0 %v2929_v53  ;;  %v419_v11 = vld [vmem:[#allocation3 + $0x178] sm:$0xff]  ;;  %v416_v15 = vld [vmem:[#allocation3 + $0x160] sm:$0xff]  ;;  %v418_v18 = vld [vmem:[#allocation3 + $0x170] sm:$0xff]  ;;  %v50_v63 = vshrl.u32 %v49_v62, 7 }
  0x25   :  { %2093 = vmatprep.subr.bf16.mxu1 %v2931_v54  ;;  %2063 = vmatpush1.bf16.msra.mxu0 %v2935_v57  ;;  %v42_v19 = vld [vmem:[%s3392_s0 + $0x28] sm:$0xff]  ;;  %v2969_v21 = vpack.c.bf16 %v419_v11, %v415_v10  ;;  %v2973_v24 = vpack.c.bf16 %v416_v15, %v412_v12  ;;  %v2975_v27 = vpack.c.bf16 %v418_v18, %v414_v16  ;;  %v423_v28 = vld [vmem:[#allocation3 + $0x198] sm:$0xff]  ;;  %v420_v32 = vld [vmem:[#allocation3 + $0x180] sm:$0xff] }
  0x26   :  { %2095 = vmatpush1.bf16.msra.mxu1 %v2937_v58  ;;  %195 = vmatprep.mubr.f32.mxu0 %v2811_v0  ;;  %v421_v22 = vld [vmem:[#allocation3 + $0x188] sm:$0xff]  ;;  %v427_v31 = vld [vmem:[#allocation3 + $0x1b8] sm:$0xff]  ;;  %v424_v33 = vld [vmem:[#allocation3 + $0x1a0] sm:$0xff]  ;;  %v51_v1 = vsub.s32 0, %v50_v63  ;;  %v55_v5 = vsub.s32 1, %v50_v63  ;;  %v59_v16 = vsub.s32 2, %v50_v63 }
  0x27   :  { %308 = vmatprep.mubr.f32.mxu1 %v2811_v0  ;;  %1957 = vmatmul.mubr.msk.f32.gmra.mrb[8].mxu0 %vm73_vm1, %v41_v2  ;;  %v425_v23 = vld [vmem:[#allocation3 + $0x1a8] sm:$0xff]  ;;  %v422_v34 = vld [vmem:[#allocation3 + $0x190] sm:$0xff]  ;;  %v2988_v38 = vpack.c.bf16 %v427_v31, %v423_v28  ;;  %v2992_v43 = vpack.c.bf16 %v424_v33, %v420_v32  ;;  %v431_v47 = vld [vmem:[#allocation3 + $0x1d8] sm:$0xff]  ;;  %v63_v31 = vsub.s32 3, %v50_v63 }
  0x28   :  { %1967 = vmatmul.mubr.msk.f32.gmra.mrb[8].mxu1 %vm73_vm1, %v41_v2  ;;  %2065 = vmatprep.subr.bf16.mxu0 %v2948_v3  ;;  %v426_v35 = vld [vmem:[#allocation3 + $0x1b0] sm:$0xff]  ;;  %v2986_v37 = vpack.c.bf16 %v425_v23, %v421_v22  ;;  %v429_v39 = vld [vmem:[#allocation3 + $0x1c8] sm:$0xff]  ;;  %v435_v48 = vld [vmem:[#allocation3 + $0x1f8] sm:$0xff] }
  0x29   :  { %2097 = vmatprep.subr.bf16.mxu1 %v2950_v4  ;;  %2067 = vmatpush1.bf16.msra.mxu0 %v2954_v7  ;;  %v43_v36 = vld [vmem:[%s3392_s0 + $0x30] sm:$0xff]  ;;  %v433_v42 = vld [vmem:[#allocation3 + $0x1e8] sm:$0xff]  ;;  %v2994_v46 = vpack.c.bf16 %v426_v35, %v422_v34  ;;  %v428_v49 = vld [vmem:[#allocation3 + $0x1c0] sm:$0xff]  ;;  %v3007_v59 = vpack.c.bf16 %v435_v48, %v431_v47 }
  0x2a   :  { %2099 = vmatpush1.bf16.msra.mxu1 %v2956_v8  ;;  %201 = vmatprep.mubr.f32.mxu0 %v2811_v0  ;;  %v432_v50 = vld [vmem:[#allocation3 + $0x1e0] sm:$0xff]  ;;  %v430_v51 = vld [vmem:[#allocation3 + $0x1d0] sm:$0xff]  ;;  %v44_v55 = vld [vmem:[%s3392_s0 + $0x38] sm:$0xff]  ;;  %v3005_v56 = vpack.c.bf16 %v433_v42, %v429_v39 }
  0x2b   :  { %314 = vmatprep.mubr.f32.mxu1 %v2811_v0  ;;  %1958 = vmatmul.mubr.msk.f32.gmra.mrb[10].mxu0 %vm73_vm1, %v42_v19  ;;  %v434_v52 = vld [vmem:[#allocation3 + $0x1f0] sm:$0xff]  ;;  %v3011_v60 = vpack.c.bf16 %v432_v50, %v428_v49  ;;  %v47_v2 = vld [vmem:[%s3395_s3] sm:$0xf] }
  0x2c   :  { %1968 = vmatmul.mubr.msk.f32.gmra.mrb[10].mxu1 %vm73_vm1, %v42_v19  ;;  %2069 = vmatprep.subr.bf16.mxu0 %v2967_v20  ;;  %v3013_v61 = vpack.c.bf16 %v434_v52, %v430_v51  ;;  %v3066_v6 = vrot.slane %v47_v2, %v51_v1  ;;  %v3068_v10 = vrot.slane %v47_v2, %v55_v5 }
  0x2d   :  { %2101 = vmatprep.subr.bf16.mxu1 %v2969_v21  ;;  %2071 = vmatpush1.bf16.msra.mxu0 %v2973_v24  ;;  %v3072_v32 = vrot.slane %v47_v2, %v59_v16  ;;  %v3074_v33 = vrot.slane %v47_v2, %v63_v31 }
  0x2e   :  { %2103 = vmatpush1.bf16.msra.mxu1 %v2975_v27  ;;  %207 = vmatprep.mubr.f32.mxu0 %v2811_v0 }
  0x2f   :  { %320 = vmatprep.mubr.f32.mxu1 %v2811_v0  ;;  %1959 = vmatmul.mubr.msk.f32.gmra.mrb[12].mxu0 %vm73_vm1, %v43_v36 }
  0x30   :  { %1969 = vmatmul.mubr.msk.f32.gmra.mrb[12].mxu1 %vm73_vm1, %v43_v36  ;;  %2073 = vmatprep.subr.bf16.mxu0 %v2986_v37 }
  0x31   :  { %2105 = vmatprep.subr.bf16.mxu1 %v2988_v38  ;;  %2075 = vmatpush1.bf16.msra.mxu0 %v2992_v43 }
  0x32   :  { %2107 = vmatpush1.bf16.msra.mxu1 %v2994_v46  ;;  %213 = vmatprep.mubr.f32.mxu0 %v2811_v0 }
  0x33   :  { %326 = vmatprep.mubr.f32.mxu1 %v2811_v0  ;;  %1960 = vmatmul.mubr.msk.f32.gmra.mrb[14].mxu0 %vm73_vm1, %v44_v55 }
  0x34   :  { %1970 = vmatmul.mubr.msk.f32.gmra.mrb[14].mxu1 %vm73_vm1, %v44_v55  ;;  %2077 = vmatprep.subr.bf16.mxu0 %v3005_v56 }
  0x35   :  { %2109 = vmatprep.subr.bf16.mxu1 %v3007_v59  ;;  %2079 = vmatpush1.bf16.msra.mxu0 %v3011_v60 }
  0x36   :  { %2111 = vmatpush1.bf16.msra.mxu1 %v3013_v61  ;;  %500 = vmatprep.mubr.f32.mxu0 %v2811_v0 }
  0x37   :  { %571 = vmatprep.mubr.f32.mxu1 %v2811_v0  ;;  %2113 = vmatprep.subr.bf16.mxu0 %v2872_v9 }
  0x38   :  { %2145 = vmatprep.subr.bf16.mxu1 %v2876_v13  ;;  %501 = vmatmul.mubr.f32.vlgmr.msra.gmra.mrb[0].mxu0 %v2811_v0 }
  0x39   :  { %572 = vmatmul.mubr.f32.vlgmr.msra.gmra.mrb[0].mxu1 %v2811_v0  ;;  %2115 = vmatpush1.bf16.msra.mxu0 %v2878_v14 }
  0x3a   :  { %2147 = vmatpush1.bf16.msra.mxu1 %v2882_v17  ;;  %2117 = vmatprep.subr.bf16.mxu0 %v2891_v25 }
  0x3b   :  { %2149 = vmatprep.subr.bf16.mxu1 %v2893_v26  ;;  %677 = vmatprep.mubr.f32.mxu0 %v2811_v0 }
  0x3c   :  { %748 = vmatprep.mubr.f32.mxu1 %v2811_v0 }
  0x3d   :  { %2119 = vmatpush1.bf16.msra.mxu0 %v2897_v29 }
  0x3e   :  { %2151 = vmatpush1.bf16.msra.mxu1 %v2899_v30  ;;  %2121 = vmatprep.subr.bf16.mxu0 %v2910_v40 }
  0x3f   :  { %2153 = vmatprep.subr.bf16.mxu1 %v2912_v41 }
  0x41   :  { %2123 = vmatpush1.bf16.msra.mxu0 %v2916_v44 }
  0x42   :  { %2155 = vmatpush1.bf16.msra.mxu1 %v2918_v45  ;;  %2125 = vmatprep.subr.bf16.mxu0 %v2929_v53 }
  0x43   :  { %2157 = vmatprep.subr.bf16.mxu1 %v2931_v54 }
  0x45   :  { %2127 = vmatpush1.bf16.msra.mxu0 %v2935_v57 }
  0x46   :  { %2159 = vmatpush1.bf16.msra.mxu1 %v2937_v58  ;;  %2129 = vmatprep.subr.bf16.mxu0 %v2948_v3 }
  0x47   :  { %2161 = vmatprep.subr.bf16.mxu1 %v2950_v4 }
  0x49   :  { %2131 = vmatpush1.bf16.msra.mxu0 %v2954_v7 }
  0x4a   :  { %2163 = vmatpush1.bf16.msra.mxu1 %v2956_v8  ;;  %2133 = vmatprep.subr.bf16.mxu0 %v2967_v20 }
  0x4b   :  { %2165 = vmatprep.subr.bf16.mxu1 %v2969_v21 }
  0x4d   :  { %2135 = vmatpush1.bf16.msra.mxu0 %v2973_v24 }
  0x4e   :  { %2167 = vmatpush1.bf16.msra.mxu1 %v2975_v27  ;;  %2137 = vmatprep.subr.bf16.mxu0 %v2986_v37 }
  0x4f   :  { %2169 = vmatprep.subr.bf16.mxu1 %v2988_v38 }
  0x51   :  { %2139 = vmatpush1.bf16.msra.mxu0 %v2992_v43 }
  0x52   :  { %2171 = vmatpush1.bf16.msra.mxu1 %v2994_v46  ;;  %2141 = vmatprep.subr.bf16.mxu0 %v3005_v56 }
  0x53   :  { %2173 = vmatprep.subr.bf16.mxu1 %v3007_v59 }
  0x55   :  { %2143 = vmatpush1.bf16.msra.mxu0 %v3011_v60 }
  0x56   :  { %2175 = vmatpush1.bf16.msra.mxu1 %v3013_v61  ;;  %2177 = vmatprep.subr.bf16.mxu0 %v2872_v9 }
  0x57   :  { %2209 = vmatprep.subr.bf16.mxu1 %v2876_v13 }
 0x10b   :  { %v502_v11 = vpop.f32.mrb[0].mxu0 }
 0x10c   :  { %v573_v12 = vpop.f32.mrb[0].mxu1  ;;  %v2584_v15 = vadd.f32 %v502_v11, %v3066_v6  ;;  %v504_v18 = vpop.f32.mrb[1].mxu0 }
 0x10d   :  { %v575_v19 = vpop.f32.mrb[1].mxu1  ;;  %v2585_v22 = vadd.f32 %v504_v18, %v3068_v10  ;;  %v2600_v34 = vadd.f32 %v573_v12, %v3072_v32 }
 0x10e   :  { %v1971_v23 = vmul.f32 -1.442695, %v2584_v15  ;;  %v2601_v35 = vadd.f32 %v575_v19, %v3074_v33 }
 0x10f   :  { %v1972_v28 = vmul.f32 -1.442695, %v2585_v22  ;;  %v1973_v36 = vmul.f32 -1.442695, %v2600_v34 }
 0x110   :  { %2656 = vpow2.f32 %v1971_v23 }
 0x111   :  { %2658 = vpow2.f32 %v1972_v28 }
 0x112   :  { %2660 = vtanh.f32 %v2601_v35 }
 0x113   :  { %2662 = vpow2.f32 %v1973_v36 }
 0x11a   :  { %v2657_v39 = vpop.eup %2656 }
 0x11b   :  { %v591_v42 = vadd.f32 1.0, %v2657_v39  ;;  %v2659_v47 = vpop.eup %2658 }
 0x11c   :  { %v592_v48 = vadd.f32 1.0, %v2659_v47  ;;  %v2661_v49 = vpop.eup %2660 }
 0x11d   :  { %2664 = vrcp.f32 %v591_v42  ;;  %v2663_v50 = vpop.eup %2662 }
 0x11e   :  { %2666 = vrcp.f32 %v592_v48  ;;  %v593_v62 = vadd.f32 1.0, %v2663_v50 }
 0x120   :  { %2668 = vrcp.f32 %v593_v62 }
 0x127   :  { %v2665_v51 = vpop.eup %2664 }
 0x128   :  { %v602_v52 = vmul.f32 %v2665_v51, %v2661_v49  ;;  %v2667_v55 = vpop.eup %2666 }
 0x129   :  { %v601_v63 = vmul.f32 0.0, %v2667_v55 }
 0x12a   :  { %v2669_v2 = vpop.eup %2668 }
 0x12b   :  { %v3078_v1 = vadd.f32 %v602_v52, %v601_v63 }
 0x12d   :  { %2670 = vtanh.f32 %v3078_v1 }
 0x137   :  { %v2671_v5 = vpop.eup %2670 }
 0x138   :  { %v605_v11 = vmul.f32 %v2671_v5, %v2669_v2 }
 0x13a   :  { %678 = vmatmul.mubr.f32.vlgmr.msra.gmra.mrb[2].mxu0 %v605_v11  ;;  %749 = vmatmul.mubr.f32.vlgmr.msra.gmra.mrb[2].mxu1 %v605_v11 }
 0x13b   :  { %2179 = vmatpush1.bf16.msra.mxu0 %v2878_v14  ;;  %2211 = vmatpush1.bf16.msra.mxu1 %v2882_v17 }
 0x13c   :  { %2181 = vmatprep.subr.bf16.mxu0 %v2891_v25  ;;  %2213 = vmatprep.subr.bf16.mxu1 %v2893_v26 }
 0x13d   :  { %854 = vmatprep.mubr.f32.mxu0 %v2811_v0  ;;  %925 = vmatprep.mubr.f32.mxu1 %v2811_v0 }
 0x13f   :  { %2183 = vmatpush1.bf16.msra.mxu0 %v2897_v29  ;;  %2215 = vmatpush1.bf16.msra.mxu1 %v2899_v30 }
 0x140   :  { %2185 = vmatprep.subr.bf16.mxu0 %v2910_v40  ;;  %2217 = vmatprep.subr.bf16.mxu1 %v2912_v41 }
 0x143   :  { %2187 = vmatpush1.bf16.msra.mxu0 %v2916_v44  ;;  %2219 = vmatpush1.bf16.msra.mxu1 %v2918_v45 }
 0x144   :  { %2189 = vmatprep.subr.bf16.mxu0 %v2929_v53  ;;  %2221 = vmatprep.subr.bf16.mxu1 %v2931_v54 }
 0x147   :  { %2191 = vmatpush1.bf16.msra.mxu0 %v2935_v57  ;;  %2223 = vmatpush1.bf16.msra.mxu1 %v2937_v58 }
 0x148   :  { %2193 = vmatprep.subr.bf16.mxu0 %v2948_v3  ;;  %2225 = vmatprep.subr.bf16.mxu1 %v2950_v4 }
 0x14b   :  { %2195 = vmatpush1.bf16.msra.mxu0 %v2954_v7  ;;  %2227 = vmatpush1.bf16.msra.mxu1 %v2956_v8 }
 0x14c   :  { %2197 = vmatprep.subr.bf16.mxu0 %v2967_v20  ;;  %2229 = vmatprep.subr.bf16.mxu1 %v2969_v21 }
 0x14f   :  { %2199 = vmatpush1.bf16.msra.mxu0 %v2973_v24  ;;  %2231 = vmatpush1.bf16.msra.mxu1 %v2975_v27 }
 0x150   :  { %2201 = vmatprep.subr.bf16.mxu0 %v2986_v37  ;;  %2233 = vmatprep.subr.bf16.mxu1 %v2988_v38 }
 0x153   :  { %2203 = vmatpush1.bf16.msra.mxu0 %v2992_v43  ;;  %2235 = vmatpush1.bf16.msra.mxu1 %v2994_v46 }
 0x154   :  { %2205 = vmatprep.subr.bf16.mxu0 %v3005_v56  ;;  %2237 = vmatprep.subr.bf16.mxu1 %v3007_v59 }
 0x157   :  { %2207 = vmatpush1.bf16.msra.mxu0 %v3011_v60  ;;  %2239 = vmatpush1.bf16.msra.mxu1 %v3013_v61 }
 0x158   :  { %2241 = vmatprep.subr.bf16.mxu0 %v2872_v9  ;;  %2273 = vmatprep.subr.bf16.mxu1 %v2876_v13 }
 0x20d   :  { %v679_v12 = vpop.f32.mrb[2].mxu0  ;;  %v750_v15 = vpop.f32.mrb[2].mxu1 }
 0x20e   :  { %v2586_v16 = vadd.f32 %v679_v12, %v3066_v6  ;;  %v681_v18 = vpop.f32.mrb[3].mxu0  ;;  %v752_v19 = vpop.f32.mrb[3].mxu1  ;;  %v2602_v31 = vadd.f32 %v750_v15, %v3072_v32 }
 0x20f   :  { %v2587_v22 = vadd.f32 %v681_v18, %v3068_v10  ;;  %v2603_v34 = vadd.f32 %v752_v19, %v3074_v33 }
 0x210   :  { %v1974_v23 = vmul.f32 -1.442695, %v2586_v16  ;;  %v1976_v35 = vmul.f32 -1.442695, %v2602_v31 }
 0x211   :  { %v1975_v28 = vmul.f32 -1.442695, %v2587_v22 }
 0x212   :  { %2672 = vpow2.f32 %v1974_v23 }
 0x213   :  { %2674 = vpow2.f32 %v1975_v28 }
 0x214   :  { %2676 = vtanh.f32 %v2603_v34 }
 0x215   :  { %2678 = vpow2.f32 %v1976_v35 }
 0x21c   :  { %v2673_v36 = vpop.eup %2672 }
 0x21d   :  { %v768_v39 = vadd.f32 1.0, %v2673_v36  ;;  %v2675_v42 = vpop.eup %2674 }
 0x21e   :  { %v769_v47 = vadd.f32 1.0, %v2675_v42  ;;  %v2677_v48 = vpop.eup %2676 }
 0x21f   :  { %2680 = vrcp.f32 %v768_v39  ;;  %v2679_v49 = vpop.eup %2678 }
 0x220   :  { %2682 = vrcp.f32 %v769_v47  ;;  %v770_v55 = vadd.f32 1.0, %v2679_v49 }
 0x222   :  { %2684 = vrcp.f32 %v770_v55 }
 0x229   :  { %v2681_v50 = vpop.eup %2680 }
 0x22a   :  { %v779_v51 = vmul.f32 %v2681_v50, %v2677_v48  ;;  %v2683_v52 = vpop.eup %2682 }
 0x22b   :  { %v778_v62 = vmul.f32 %v2683_v52, %v3078_v1 }
 0x22c   :  { %v2685_v2 = vpop.eup %2684 }
 0x22d   :  { %v3120_v63 = vadd.f32 %v779_v51, %v778_v62 }
 0x22f   :  { %2686 = vtanh.f32 %v3120_v63 }
 0x239   :  { %v2687_v5 = vpop.eup %2686 }
 0x23a   :  { %v782_v11 = vmul.f32 %v2687_v5, %v2685_v2 }
 0x23c   :  { %855 = vmatmul.mubr.f32.vlgmr.msra.gmra.mrb[4].mxu0 %v782_v11  ;;  %926 = vmatmul.mubr.f32.vlgmr.msra.gmra.mrb[4].mxu1 %v782_v11 }
 0x23d   :  { %2243 = vmatpush1.bf16.msra.mxu0 %v2878_v14  ;;  %2275 = vmatpush1.bf16.msra.mxu1 %v2882_v17 }
 0x23e   :  { %2245 = vmatprep.subr.bf16.mxu0 %v2891_v25  ;;  %2277 = vmatprep.subr.bf16.mxu1 %v2893_v26 }
 0x23f   :  { %1031 = vmatprep.mubr.f32.mxu0 %v2811_v0  ;;  %1102 = vmatprep.mubr.f32.mxu1 %v2811_v0 }
 0x241   :  { %2247 = vmatpush1.bf16.msra.mxu0 %v2897_v29  ;;  %2279 = vmatpush1.bf16.msra.mxu1 %v2899_v30 }
 0x242   :  { %2249 = vmatprep.subr.bf16.mxu0 %v2910_v40  ;;  %2281 = vmatprep.subr.bf16.mxu1 %v2912_v41 }
 0x245   :  { %2251 = vmatpush1.bf16.msra.mxu0 %v2916_v44  ;;  %2283 = vmatpush1.bf16.msra.mxu1 %v2918_v45 }
 0x246   :  { %2253 = vmatprep.subr.bf16.mxu0 %v2929_v53  ;;  %2285 = vmatprep.subr.bf16.mxu1 %v2931_v54 }
 0x249   :  { %2255 = vmatpush1.bf16.msra.mxu0 %v2935_v57  ;;  %2287 = vmatpush1.bf16.msra.mxu1 %v2937_v58 }
 0x24a   :  { %2257 = vmatprep.subr.bf16.mxu0 %v2948_v3  ;;  %2289 = vmatprep.subr.bf16.mxu1 %v2950_v4 }
 0x24d   :  { %2259 = vmatpush1.bf16.msra.mxu0 %v2954_v7  ;;  %2291 = vmatpush1.bf16.msra.mxu1 %v2956_v8 }
 0x24e   :  { %2261 = vmatprep.subr.bf16.mxu0 %v2967_v20  ;;  %2293 = vmatprep.subr.bf16.mxu1 %v2969_v21 }
 0x251   :  { %2263 = vmatpush1.bf16.msra.mxu0 %v2973_v24  ;;  %2295 = vmatpush1.bf16.msra.mxu1 %v2975_v27 }
 0x252   :  { %2265 = vmatprep.subr.bf16.mxu0 %v2986_v37  ;;  %2297 = vmatprep.subr.bf16.mxu1 %v2988_v38 }
 0x255   :  { %2267 = vmatpush1.bf16.msra.mxu0 %v2992_v43  ;;  %2299 = vmatpush1.bf16.msra.mxu1 %v2994_v46 }
 0x256   :  { %2269 = vmatprep.subr.bf16.mxu0 %v3005_v56  ;;  %2301 = vmatprep.subr.bf16.mxu1 %v3007_v59 }
 0x259   :  { %2271 = vmatpush1.bf16.msra.mxu0 %v3011_v60  ;;  %2303 = vmatpush1.bf16.msra.mxu1 %v3013_v61 }
 0x25a   :  { %2305 = vmatprep.subr.bf16.mxu0 %v2872_v9  ;;  %2337 = vmatprep.subr.bf16.mxu1 %v2876_v13 }
 0x30f   :  { %v856_v1 = vpop.f32.mrb[4].mxu0  ;;  %v927_v12 = vpop.f32.mrb[4].mxu1 }
 0x310   :  { %v2588_v15 = vadd.f32 %v856_v1, %v3066_v6  ;;  %v858_v16 = vpop.f32.mrb[5].mxu0  ;;  %v929_v18 = vpop.f32.mrb[5].mxu1  ;;  %v2604_v28 = vadd.f32 %v927_v12, %v3072_v32 }
 0x311   :  { %v2589_v19 = vadd.f32 %v858_v16, %v3068_v10  ;;  %v2605_v31 = vadd.f32 %v929_v18, %v3074_v33 }
 0x312   :  { %v1977_v22 = vmul.f32 -1.442695, %v2588_v15  ;;  %v1979_v34 = vmul.f32 -1.442695, %v2604_v28 }
 0x313   :  { %v1978_v23 = vmul.f32 -1.442695, %v2589_v19 }
 0x314   :  { %2688 = vpow2.f32 %v1977_v22 }
 0x315   :  { %2690 = vpow2.f32 %v1978_v23 }
 0x316   :  { %2692 = vtanh.f32 %v2605_v31 }
 0x317   :  { %2694 = vpow2.f32 %v1979_v34 }
 0x31e   :  { %v2689_v35 = vpop.eup %2688 }
 0x31f   :  { %v945_v36 = vadd.f32 1.0, %v2689_v35  ;;  %v2691_v39 = vpop.eup %2690 }
 0x320   :  { %v946_v42 = vadd.f32 1.0, %v2691_v39  ;;  %v2693_v47 = vpop.eup %2692 }
 0x321   :  { %2696 = vrcp.f32 %v945_v36  ;;  %v2695_v48 = vpop.eup %2694 }
 0x322   :  { %2698 = vrcp.f32 %v946_v42  ;;  %v947_v52 = vadd.f32 1.0, %v2695_v48 }
 0x324   :  { %2700 = vrcp.f32 %v947_v52 }
 0x32b   :  { %v2697_v49 = vpop.eup %2696 }
 0x32c   :  { %v956_v50 = vmul.f32 %v2697_v49, %v2693_v47  ;;  %v2699_v51 = vpop.eup %2698 }
 0x32d   :  { %v955_v55 = vmul.f32 %v2699_v51, %v3120_v63 }
 0x32e   :  { %v2701_v2 = vpop.eup %2700 }
 0x32f   :  { %v3162_v62 = vadd.f32 %v956_v50, %v955_v55 }
 0x331   :  { %2702 = vtanh.f32 %v3162_v62 }
 0x33b   :  { %v2703_v5 = vpop.eup %2702 }
 0x33c   :  { %v959_v11 = vmul.f32 %v2703_v5, %v2701_v2 }
 0x33e   :  { %1032 = vmatmul.mubr.f32.vlgmr.msra.gmra.mrb[6].mxu0 %v959_v11  ;;  %1103 = vmatmul.mubr.f32.vlgmr.msra.gmra.mrb[6].mxu1 %v959_v11 }
 0x33f   :  { %2307 = vmatpush1.bf16.msra.mxu0 %v2878_v14  ;;  %2339 = vmatpush1.bf16.msra.mxu1 %v2882_v17 }
 0x340   :  { %2309 = vmatprep.subr.bf16.mxu0 %v2891_v25  ;;  %2341 = vmatprep.subr.bf16.mxu1 %v2893_v26 }
 0x341   :  { %1208 = vmatprep.mubr.f32.mxu0 %v2811_v0  ;;  %1279 = vmatprep.mubr.f32.mxu1 %v2811_v0 }
 0x343   :  { %2311 = vmatpush1.bf16.msra.mxu0 %v2897_v29  ;;  %2343 = vmatpush1.bf16.msra.mxu1 %v2899_v30 }
 0x344   :  { %2313 = vmatprep.subr.bf16.mxu0 %v2910_v40  ;;  %2345 = vmatprep.subr.bf16.mxu1 %v2912_v41 }
 0x347   :  { %2315 = vmatpush1.bf16.msra.mxu0 %v2916_v44  ;;  %2347 = vmatpush1.bf16.msra.mxu1 %v2918_v45 }
 0x348   :  { %2317 = vmatprep.subr.bf16.mxu0 %v2929_v53  ;;  %2349 = vmatprep.subr.bf16.mxu1 %v2931_v54 }
 0x34b   :  { %2319 = vmatpush1.bf16.msra.mxu0 %v2935_v57  ;;  %2351 = vmatpush1.bf16.msra.mxu1 %v2937_v58 }
 0x34c   :  { %2321 = vmatprep.subr.bf16.mxu0 %v2948_v3  ;;  %2353 = vmatprep.subr.bf16.mxu1 %v2950_v4 }
 0x34f   :  { %2323 = vmatpush1.bf16.msra.mxu0 %v2954_v7  ;;  %2355 = vmatpush1.bf16.msra.mxu1 %v2956_v8 }
 0x350   :  { %2325 = vmatprep.subr.bf16.mxu0 %v2967_v20  ;;  %2357 = vmatprep.subr.bf16.mxu1 %v2969_v21 }
 0x353   :  { %2327 = vmatpush1.bf16.msra.mxu0 %v2973_v24  ;;  %2359 = vmatpush1.bf16.msra.mxu1 %v2975_v27 }
 0x354   :  { %2329 = vmatprep.subr.bf16.mxu0 %v2986_v37  ;;  %2361 = vmatprep.subr.bf16.mxu1 %v2988_v38 }
 0x357   :  { %2331 = vmatpush1.bf16.msra.mxu0 %v2992_v43  ;;  %2363 = vmatpush1.bf16.msra.mxu1 %v2994_v46 }
 0x358   :  { %2333 = vmatprep.subr.bf16.mxu0 %v3005_v56  ;;  %2365 = vmatprep.subr.bf16.mxu1 %v3007_v59 }
 0x35b   :  { %2335 = vmatpush1.bf16.msra.mxu0 %v3011_v60  ;;  %2367 = vmatpush1.bf16.msra.mxu1 %v3013_v61 }
 0x35c   :  { %2369 = vmatprep.subr.bf16.mxu0 %v2872_v9  ;;  %2401 = vmatprep.subr.bf16.mxu1 %v2876_v13 }
 0x411   :  { %v1033_v63 = vpop.f32.mrb[6].mxu0  ;;  %v1104_v1 = vpop.f32.mrb[6].mxu1 }
 0x412   :  { %v2590_v12 = vadd.f32 %v1033_v63, %v3066_v6  ;;  %v1035_v15 = vpop.f32.mrb[7].mxu0  ;;  %v1106_v16 = vpop.f32.mrb[7].mxu1  ;;  %v2606_v23 = vadd.f32 %v1104_v1, %v3072_v32 }
 0x413   :  { %v2591_v18 = vadd.f32 %v1035_v15, %v3068_v10  ;;  %v2607_v28 = vadd.f32 %v1106_v16, %v3074_v33 }
 0x414   :  { %v1980_v19 = vmul.f32 -1.442695, %v2590_v12  ;;  %v1982_v31 = vmul.f32 -1.442695, %v2606_v23 }
 0x415   :  { %v1981_v22 = vmul.f32 -1.442695, %v2591_v18 }
 0x416   :  { %2704 = vpow2.f32 %v1980_v19 }
 0x417   :  { %2706 = vpow2.f32 %v1981_v22 }
 0x418   :  { %2708 = vtanh.f32 %v2607_v28 }
 0x419   :  { %2710 = vpow2.f32 %v1982_v31 }
 0x420   :  { %v2705_v34 = vpop.eup %2704 }
 0x421   :  { %v1122_v35 = vadd.f32 1.0, %v2705_v34  ;;  %v2707_v36 = vpop.eup %2706 }
 0x422   :  { %v1123_v39 = vadd.f32 1.0, %v2707_v36  ;;  %v2709_v42 = vpop.eup %2708 }
 0x423   :  { %2712 = vrcp.f32 %v1122_v35  ;;  %v2711_v47 = vpop.eup %2710 }
 0x424   :  { %2714 = vrcp.f32 %v1123_v39  ;;  %v1124_v51 = vadd.f32 1.0, %v2711_v47 }
 0x426   :  { %2716 = vrcp.f32 %v1124_v51 }
 0x42d   :  { %v2713_v48 = vpop.eup %2712 }
 0x42e   :  { %v1133_v49 = vmul.f32 %v2713_v48, %v2709_v42  ;;  %v2715_v50 = vpop.eup %2714 }
 0x42f   :  { %v1132_v52 = vmul.f32 %v2715_v50, %v3162_v62 }
 0x430   :  { %v2717_v2 = vpop.eup %2716 }
 0x431   :  { %v3204_v55 = vadd.f32 %v1133_v49, %v1132_v52 }
 0x433   :  { %2718 = vtanh.f32 %v3204_v55 }
 0x43d   :  { %v2719_v5 = vpop.eup %2718 }
 0x43e   :  { %v1136_v11 = vmul.f32 %v2719_v5, %v2717_v2 }
 0x440   :  { %1209 = vmatmul.mubr.f32.vlgmr.msra.gmra.mrb[8].mxu0 %v1136_v11  ;;  %1280 = vmatmul.mubr.f32.vlgmr.msra.gmra.mrb[8].mxu1 %v1136_v11 }
 0x441   :  { %2371 = vmatpush1.bf16.msra.mxu0 %v2878_v14  ;;  %2403 = vmatpush1.bf16.msra.mxu1 %v2882_v17 }
 0x442   :  { %2373 = vmatprep.subr.bf16.mxu0 %v2891_v25  ;;  %2405 = vmatprep.subr.bf16.mxu1 %v2893_v26 }
 0x443   :  { %1385 = vmatprep.mubr.f32.mxu0 %v2811_v0  ;;  %1456 = vmatprep.mubr.f32.mxu1 %v2811_v0 }
 0x445   :  { %2375 = vmatpush1.bf16.msra.mxu0 %v2897_v29  ;;  %2407 = vmatpush1.bf16.msra.mxu1 %v2899_v30 }
 0x446   :  { %2377 = vmatprep.subr.bf16.mxu0 %v2910_v40  ;;  %2409 = vmatprep.subr.bf16.mxu1 %v2912_v41 }
 0x449   :  { %2379 = vmatpush1.bf16.msra.mxu0 %v2916_v44  ;;  %2411 = vmatpush1.bf16.msra.mxu1 %v2918_v45 }
 0x44a   :  { %2381 = vmatprep.subr.bf16.mxu0 %v2929_v53  ;;  %2413 = vmatprep.subr.bf16.mxu1 %v2931_v54 }
 0x44d   :  { %2383 = vmatpush1.bf16.msra.mxu0 %v2935_v57  ;;  %2415 = vmatpush1.bf16.msra.mxu1 %v2937_v58 }
 0x44e   :  { %2385 = vmatprep.subr.bf16.mxu0 %v2948_v3  ;;  %2417 = vmatprep.subr.bf16.mxu1 %v2950_v4 }
 0x451   :  { %2387 = vmatpush1.bf16.msra.mxu0 %v2954_v7  ;;  %2419 = vmatpush1.bf16.msra.mxu1 %v2956_v8 }
 0x452   :  { %2389 = vmatprep.subr.bf16.mxu0 %v2967_v20  ;;  %2421 = vmatprep.subr.bf16.mxu1 %v2969_v21 }
 0x455   :  { %2391 = vmatpush1.bf16.msra.mxu0 %v2973_v24  ;;  %2423 = vmatpush1.bf16.msra.mxu1 %v2975_v27 }
 0x456   :  { %2393 = vmatprep.subr.bf16.mxu0 %v2986_v37  ;;  %2425 = vmatprep.subr.bf16.mxu1 %v2988_v38 }
 0x459   :  { %2395 = vmatpush1.bf16.msra.mxu0 %v2992_v43  ;;  %2427 = vmatpush1.bf16.msra.mxu1 %v2994_v46 }
 0x45a   :  { %2397 = vmatprep.subr.bf16.mxu0 %v3005_v56  ;;  %2429 = vmatprep.subr.bf16.mxu1 %v3007_v59 }
 0x45d   :  { %2399 = vmatpush1.bf16.msra.mxu0 %v3011_v60  ;;  %2431 = vmatpush1.bf16.msra.mxu1 %v3013_v61 }
 0x45e   :  { %2433 = vmatprep.subr.bf16.mxu0 %v2872_v9  ;;  %2465 = vmatprep.subr.bf16.mxu1 %v2876_v13 }
 0x513   :  { %v1210_v62 = vpop.f32.mrb[8].mxu0  ;;  %v1281_v63 = vpop.f32.mrb[8].mxu1 }
 0x514   :  { %v2592_v1 = vadd.f32 %v1210_v62, %v3066_v6  ;;  %v1212_v12 = vpop.f32.mrb[9].mxu0  ;;  %v1283_v15 = vpop.f32.mrb[9].mxu1  ;;  %v2608_v22 = vadd.f32 %v1281_v63, %v3072_v32 }
 0x515   :  { %v2593_v16 = vadd.f32 %v1212_v12, %v3068_v10  ;;  %v2609_v23 = vadd.f32 %v1283_v15, %v3074_v33 }
 0x516   :  { %v1983_v18 = vmul.f32 -1.442695, %v2592_v1  ;;  %v1985_v28 = vmul.f32 -1.442695, %v2608_v22 }
 0x517   :  { %v1984_v19 = vmul.f32 -1.442695, %v2593_v16 }
 0x518   :  { %2720 = vpow2.f32 %v1983_v18 }
 0x519   :  { %2722 = vpow2.f32 %v1984_v19 }
 0x51a   :  { %2724 = vtanh.f32 %v2609_v23 }
 0x51b   :  { %2726 = vpow2.f32 %v1985_v28 }
 0x522   :  { %v2721_v31 = vpop.eup %2720 }
 0x523   :  { %v1299_v34 = vadd.f32 1.0, %v2721_v31  ;;  %v2723_v35 = vpop.eup %2722 }
 0x524   :  { %v1300_v36 = vadd.f32 1.0, %v2723_v35  ;;  %v2725_v39 = vpop.eup %2724 }
 0x525   :  { %2728 = vrcp.f32 %v1299_v34  ;;  %v2727_v42 = vpop.eup %2726 }
 0x526   :  { %2730 = vrcp.f32 %v1300_v36  ;;  %v1301_v50 = vadd.f32 1.0, %v2727_v42 }
 0x528   :  { %2732 = vrcp.f32 %v1301_v50 }
 0x52f   :  { %v2729_v47 = vpop.eup %2728 }
 0x530   :  { %v1310_v48 = vmul.f32 %v2729_v47, %v2725_v39  ;;  %v2731_v49 = vpop.eup %2730 }
 0x531   :  { %v1309_v51 = vmul.f32 %v2731_v49, %v3204_v55 }
 0x532   :  { %v2733_v2 = vpop.eup %2732 }
 0x533   :  { %v3246_v52 = vadd.f32 %v1310_v48, %v1309_v51 }
 0x535   :  { %2734 = vtanh.f32 %v3246_v52 }
 0x53f   :  { %v2735_v5 = vpop.eup %2734 }
 0x540   :  { %v1313_v11 = vmul.f32 %v2735_v5, %v2733_v2  ;;  %v1848_v5 = vld [vmem:[%s3396_s4 + $0x18] sm:$0xff] }
 0x542   :  { %1386 = vmatmul.mubr.f32.vlgmr.msra.gmra.mrb[10].mxu0 %v1313_v11  ;;  %1457 = vmatmul.mubr.f32.vlgmr.msra.gmra.mrb[10].mxu1 %v1313_v11 }
 0x543   :  { %2435 = vmatpush1.bf16.msra.mxu0 %v2878_v14  ;;  %2467 = vmatpush1.bf16.msra.mxu1 %v2882_v17 }
 0x544   :  { %2437 = vmatprep.subr.bf16.mxu0 %v2891_v25  ;;  %2469 = vmatprep.subr.bf16.mxu1 %v2893_v26 }
 0x545   :  { %1562 = vmatprep.mubr.f32.mxu0 %v2811_v0  ;;  %1633 = vmatprep.mubr.f32.mxu1 %v2811_v0 }
 0x547   :  { %2439 = vmatpush1.bf16.msra.mxu0 %v2897_v29  ;;  %2471 = vmatpush1.bf16.msra.mxu1 %v2899_v30 }
 0x548   :  { %2441 = vmatprep.subr.bf16.mxu0 %v2910_v40  ;;  %2473 = vmatprep.subr.bf16.mxu1 %v2912_v41 }
 0x54b   :  { %2443 = vmatpush1.bf16.msra.mxu0 %v2916_v44  ;;  %2475 = vmatpush1.bf16.msra.mxu1 %v2918_v45 }
 0x54c   :  { %2445 = vmatprep.subr.bf16.mxu0 %v2929_v53  ;;  %2477 = vmatprep.subr.bf16.mxu1 %v2931_v54 }
 0x54f   :  { %2447 = vmatpush1.bf16.msra.mxu0 %v2935_v57  ;;  %2479 = vmatpush1.bf16.msra.mxu1 %v2937_v58 }
 0x550   :  { %2449 = vmatprep.subr.bf16.mxu0 %v2948_v3  ;;  %2481 = vmatprep.subr.bf16.mxu1 %v2950_v4 }
 0x553   :  { %2451 = vmatpush1.bf16.msra.mxu0 %v2954_v7  ;;  %2483 = vmatpush1.bf16.msra.mxu1 %v2956_v8 }
 0x554   :  { %2453 = vmatprep.subr.bf16.mxu0 %v2967_v20  ;;  %2485 = vmatprep.subr.bf16.mxu1 %v2969_v21 }
 0x557   :  { %2455 = vmatpush1.bf16.msra.mxu0 %v2973_v24  ;;  %2487 = vmatpush1.bf16.msra.mxu1 %v2975_v27 }
 0x558   :  { %2457 = vmatprep.subr.bf16.mxu0 %v2986_v37  ;;  %2489 = vmatprep.subr.bf16.mxu1 %v2988_v38 }
 0x55b   :  { %2459 = vmatpush1.bf16.msra.mxu0 %v2992_v43  ;;  %2491 = vmatpush1.bf16.msra.mxu1 %v2994_v46 }
 0x55c   :  { %2461 = vmatprep.subr.bf16.mxu0 %v3005_v56  ;;  %2493 = vmatprep.subr.bf16.mxu1 %v3007_v59 }
 0x55f   :  { %2463 = vmatpush1.bf16.msra.mxu0 %v3011_v60  ;;  %2495 = vmatpush1.bf16.msra.mxu1 %v3013_v61 }
 0x560   :  { %2497 = vmatprep.subr.bf16.mxu0 %v2872_v9  ;;  %2529 = vmatprep.subr.bf16.mxu1 %v2876_v13 }
 0x615   :  { %v1387_v55 = vpop.f32.mrb[10].mxu0  ;;  %v1458_v62 = vpop.f32.mrb[10].mxu1 }
 0x616   :  { %v2594_v63 = vadd.f32 %v1387_v55, %v3066_v6  ;;  %v1389_v1 = vpop.f32.mrb[11].mxu0  ;;  %v1460_v12 = vpop.f32.mrb[11].mxu1  ;;  %v2610_v19 = vadd.f32 %v1458_v62, %v3072_v32  ;;  %v1849_v55 = vld [vmem:[%s3396_s4 + $0x20] sm:$0xff]  ;;  %v1850_v62 = vld [vmem:[%s3396_s4 + $0x28] sm:$0xff] }
 0x617   :  { %v2595_v15 = vadd.f32 %v1389_v1, %v3068_v10  ;;  %v2611_v22 = vadd.f32 %v1460_v12, %v3074_v33  ;;  %v1851_v1 = vld [vmem:[%s3396_s4 + $0x30] sm:$0xff]  ;;  %v1852_v12 = vld [vmem:[%s3396_s4 + $0x38] sm:$0xff] }
 0x618   :  { %v1986_v16 = vmul.f32 -1.442695, %v2594_v63  ;;  %v1988_v23 = vmul.f32 -1.442695, %v2610_v19  ;;  %v2567_v63 = vpack.c.bf16 %v1850_v62, %v1849_v55 }
 0x619   :  { %v1987_v18 = vmul.f32 -1.442695, %v2595_v15  ;;  %v2570_v15 = vpack.c.bf16 %v1852_v12, %v1851_v1 }
 0x61a   :  { %2736 = vpow2.f32 %v1986_v16  ;;  %v1853_v16 = vld [vmem:[%s3396_s4 + $0x40] sm:$0xff] }
 0x61b   :  { %2738 = vpow2.f32 %v1987_v18  ;;  %v1854_v18 = vld [vmem:[%s3396_s4 + $0x48] sm:$0xff] }
 0x61c   :  { %2740 = vtanh.f32 %v2611_v22  ;;  %v2573_v19 = vpack.c.bf16 %v1854_v18, %v1853_v16  ;;  %v1855_v22 = vld [vmem:[%s3396_s4 + $0x50] sm:$0xff] }
 0x61d   :  { %2742 = vpow2.f32 %v1988_v23  ;;  %v1856_v23 = vld [vmem:[%s3396_s4 + $0x58] sm:$0xff] }
 0x624   :  { %v2737_v9 = vpop.eup %2736 }
 0x625   :  { %v1476_v28 = vadd.f32 1.0, %v2737_v9  ;;  %v2739_v13 = vpop.eup %2738  ;;  %v2576_v9 = vpack.c.bf16 %v1856_v23, %v1855_v22 }
 0x626   :  { %v1477_v31 = vadd.f32 1.0, %v2739_v13  ;;  %v2741_v34 = vpop.eup %2740  ;;  %v1858_v13 = vld [vmem:[%s3396_s4 + $0x68] sm:$0xff] }
 0x627   :  { %2744 = vrcp.f32 %v1476_v28  ;;  %v2743_v35 = vpop.eup %2742  ;;  %v1857_v28 = vld [vmem:[%s3396_s4 + $0x60] sm:$0xff] }
 0x628   :  { %2746 = vrcp.f32 %v1477_v31  ;;  %v1478_v47 = vadd.f32 1.0, %v2743_v35  ;;  %v2579_v31 = vpack.c.bf16 %v1858_v13, %v1857_v28  ;;  %v1860_v35 = vld [vmem:[%s3396_s4 + $0x78] sm:$0xff] }
 0x62a   :  { %2748 = vrcp.f32 %v1478_v47 }
 0x631   :  { %v2745_v36 = vpop.eup %2744 }
 0x632   :  { %v1487_v39 = vmul.f32 %v2745_v36, %v2741_v34  ;;  %v2747_v42 = vpop.eup %2746  ;;  %v1859_v34 = vld [vmem:[%s3396_s4 + $0x70] sm:$0xff] }
 0x633   :  { %v1486_v48 = vmul.f32 %v2747_v42, %v3246_v52  ;;  %v1847_v52 = vld [vmem:[%s3396_s4 + $0x10] sm:$0xff]  ;;  %v2582_v36 = vpack.c.bf16 %v1860_v35, %v1859_v34 }
 0x634   :  { %v2749_v50 = vpop.eup %2748  ;;  %v2564_v11 = vpack.c.bf16 %v1848_v5, %v1847_v52 }
 0x635   :  { %v3288_v49 = vadd.f32 %v1487_v39, %v1486_v48 }
 0x637   :  { %2750 = vtanh.f32 %v3288_v49 }
 0x641   :  { %v2751_v51 = vpop.eup %2750 }
 0x642   :  { %v1490_v2 = vmul.f32 %v2751_v51, %v2749_v50 }
 0x644   :  { %1563 = vmatmul.mubr.f32.vlgmr.msra.gmra.mrb[12].mxu0 %v1490_v2  ;;  %1634 = vmatmul.mubr.f32.vlgmr.msra.gmra.mrb[12].mxu1 %v1490_v2 }
 0x645   :  { %2499 = vmatpush1.bf16.msra.mxu0 %v2878_v14  ;;  %2531 = vmatpush1.bf16.msra.mxu1 %v2882_v17 }
 0x646   :  { %2501 = vmatprep.subr.bf16.mxu0 %v2891_v25  ;;  %2533 = vmatprep.subr.bf16.mxu1 %v2893_v26 }
 0x647   :  { %1739 = vmatprep.mubr.f32.mxu0 %v2811_v0  ;;  %1810 = vmatprep.mubr.f32.mxu1 %v2811_v0 }
 0x649   :  { %2503 = vmatpush1.bf16.msra.mxu0 %v2897_v29  ;;  %2535 = vmatpush1.bf16.msra.mxu1 %v2899_v30 }
 0x64a   :  { %2505 = vmatprep.subr.bf16.mxu0 %v2910_v40  ;;  %2537 = vmatprep.subr.bf16.mxu1 %v2912_v41 }
 0x64d   :  { %2507 = vmatpush1.bf16.msra.mxu0 %v2916_v44  ;;  %2539 = vmatpush1.bf16.msra.mxu1 %v2918_v45 }
 0x64e   :  { %2509 = vmatprep.subr.bf16.mxu0 %v2929_v53  ;;  %2541 = vmatprep.subr.bf16.mxu1 %v2931_v54 }
 0x651   :  { %2511 = vmatpush1.bf16.msra.mxu0 %v2935_v57  ;;  %2543 = vmatpush1.bf16.msra.mxu1 %v2937_v58 }
 0x652   :  { %2513 = vmatprep.subr.bf16.mxu0 %v2948_v3  ;;  %2545 = vmatprep.subr.bf16.mxu1 %v2950_v4 }
 0x655   :  { %2515 = vmatpush1.bf16.msra.mxu0 %v2954_v7  ;;  %2547 = vmatpush1.bf16.msra.mxu1 %v2956_v8 }
 0x656   :  { %2517 = vmatprep.subr.bf16.mxu0 %v2967_v20  ;;  %2549 = vmatprep.subr.bf16.mxu1 %v2969_v21 }
 0x659   :  { %2519 = vmatpush1.bf16.msra.mxu0 %v2973_v24  ;;  %2551 = vmatpush1.bf16.msra.mxu1 %v2975_v27 }
 0x65a   :  { %2521 = vmatprep.subr.bf16.mxu0 %v2986_v37  ;;  %2553 = vmatprep.subr.bf16.mxu1 %v2988_v38 }
 0x65d   :  { %2523 = vmatpush1.bf16.msra.mxu0 %v2992_v43  ;;  %2555 = vmatpush1.bf16.msra.mxu1 %v2994_v46 }
 0x65e   :  { %2525 = vmatprep.subr.bf16.mxu0 %v3005_v56  ;;  %2557 = vmatprep.subr.bf16.mxu1 %v3007_v59  ;;  %v1845_v56 = vld [vmem:[%s3396_s4] sm:$0xff]  ;;  %v1846_v59 = vld [vmem:[%s3396_s4 + $0x8] sm:$0xff] }
 0x661   :  { %2527 = vmatpush1.bf16.msra.mxu0 %v3011_v60  ;;  %2559 = vmatpush1.bf16.msra.mxu1 %v3013_v61  ;;  %v2561_v60 = vpack.c.bf16 %v1846_v59, %v1845_v56  ;;  %v2812_v61 = vmov 0.0|0.0  }
 0x662   :  { %2560 = vmatprep.subr.bf16.mxu0 %v2812_v61 }
 0x717   :  { %v1564_v14 = vpop.f32.mrb[12].mxu0  ;;  %v1635_v17 = vpop.f32.mrb[12].mxu1 }
 0x718   :  { %v2596_v25 = vadd.f32 %v1564_v14, %v3066_v6  ;;  %v1566_v26 = vpop.f32.mrb[13].mxu0  ;;  %v1637_v29 = vpop.f32.mrb[13].mxu1  ;;  %v2612_v44 = vadd.f32 %v1635_v17, %v3072_v32 }
 0x719   :  { %v2597_v30 = vadd.f32 %v1566_v26, %v3068_v10  ;;  %v2613_v45 = vadd.f32 %v1637_v29, %v3074_v33 }
 0x71a   :  { %v1989_v40 = vmul.f32 -1.442695, %v2596_v25  ;;  %v1991_v53 = vmul.f32 -1.442695, %v2612_v44 }
 0x71b   :  { %v1990_v41 = vmul.f32 -1.442695, %v2597_v30 }
 0x71c   :  { %2752 = vpow2.f32 %v1989_v40 }
 0x71d   :  { %2754 = vpow2.f32 %v1990_v41 }
 0x71e   :  { %2756 = vtanh.f32 %v2613_v45 }
 0x71f   :  { %2758 = vpow2.f32 %v1991_v53 }
 0x726   :  { %v2753_v54 = vpop.eup %2752 }
 0x727   :  { %v1653_v57 = vadd.f32 1.0, %v2753_v54  ;;  %v2755_v58 = vpop.eup %2754 }
 0x728   :  { %v1654_v3 = vadd.f32 1.0, %v2755_v58  ;;  %v2757_v4 = vpop.eup %2756  ;;  %v1995_v58 = vld [vmem:[%s3397_s5] ss:$0 sm:$0xff] }
 0x729   :  { %2760 = vrcp.f32 %v1653_v57  ;;  %v2759_v7 = vpop.eup %2758 }
 0x72a   :  { %2762 = vrcp.f32 %v1654_v3  ;;  %v1655_v24 = vadd.f32 1.0, %v2759_v7 }
 0x72c   :  { %2764 = vrcp.f32 %v1655_v24 }
 0x733   :  { %v2761_v8 = vpop.eup %2760 }
 0x734   :  { %v1664_v20 = vmul.f32 %v2761_v8, %v2757_v4  ;;  %v2763_v21 = vpop.eup %2762 }
 0x735   :  { %v1663_v27 = vmul.f32 %v2763_v21, %v3288_v49 }
 0x736   :  { %v2765_v38 = vpop.eup %2764 }
 0x737   :  { %v3328_v37 = vadd.f32 %v1664_v20, %v1663_v27 }
 0x739   :  { %2766 = vtanh.f32 %v3328_v37 }
 0x743   :  { %v2767_v43 = vpop.eup %2766 }
 0x744   :  { %v1667_v46 = vmul.f32 %v2767_v43, %v2765_v38 }
 0x746   :  { %1740 = vmatmul.mubr.f32.vlgmr.msra.gmra.mrb[14].mxu0 %v1667_v46  ;;  %1811 = vmatmul.mubr.f32.vlgmr.msra.gmra.mrb[14].mxu1 %v1667_v46 }
 0x747   :  { %2562 = vmatpush3.bf16.msra.mxu0 %v2561_v60  ;;  %2045 = vmatprep.mubr.msk.f32.mxu0 %vm2813_vm2, %v2811_v0 }
 0x748   :  { %2563 = vmatprep.subr.bf16.mxu0 %v2812_v61 }
 0x74b   :  { %2565 = vmatpush3.bf16.msra.mxu0 %v2564_v11 }
 0x74c   :  { %2566 = vmatprep.subr.bf16.mxu0 %v2812_v61 }
 0x74f   :  { %2568 = vmatpush3.bf16.msra.mxu0 %v2567_v63 }
 0x750   :  { %2569 = vmatprep.subr.bf16.mxu0 %v2812_v61 }
 0x753   :  { %2571 = vmatpush3.bf16.msra.mxu0 %v2570_v15 }
 0x754   :  { %2572 = vmatprep.subr.bf16.mxu0 %v2812_v61 }
 0x757   :  { %2574 = vmatpush3.bf16.msra.mxu0 %v2573_v19 }
 0x758   :  { %2575 = vmatprep.subr.bf16.mxu0 %v2812_v61 }
 0x75b   :  { %2577 = vmatpush3.bf16.msra.mxu0 %v2576_v9 }
 0x75c   :  { %2578 = vmatprep.subr.bf16.mxu0 %v2812_v61 }
 0x75f   :  { %2580 = vmatpush3.bf16.msra.mxu0 %v2579_v31 }
 0x760   :  { %2581 = vmatprep.subr.bf16.mxu0 %v2812_v61 }
 0x763   :  { %2583 = vmatpush3.bf16.msra.mxu0 %v2582_v36 }
 0x819   :  { %v1741_v39 = vpop.f32.mrb[14].mxu0  ;;  %v1812_v42 = vpop.f32.mrb[14].mxu1 }
 0x81a   :  { %v2598_v47 = vadd.f32 %v1741_v39, %v3066_v6  ;;  %v1743_v0 = vpop.f32.mrb[15].mxu0  ;;  %v1814_v48 = vpop.f32.mrb[15].mxu1  ;;  %v2614_v2 = vadd.f32 %v1812_v42, %v3072_v32 }
 0x81b   :  { %v2599_v49 = vadd.f32 %v1743_v0, %v3068_v10  ;;  %v2615_v14 = vadd.f32 %v1814_v48, %v3074_v33 }
 0x81c   :  { %v1992_v50 = vmul.f32 -1.442695, %v2598_v47  ;;  %v1994_v17 = vmul.f32 -1.442695, %v2614_v2 }
 0x81d   :  { %v1993_v51 = vmul.f32 -1.442695, %v2599_v49 }
 0x81e   :  { %2768 = vpow2.f32 %v1992_v50 }
 0x81f   :  { %2770 = vpow2.f32 %v1993_v51 }
 0x820   :  { %2772 = vtanh.f32 %v2615_v14 }
 0x821   :  { %2774 = vpow2.f32 %v1994_v17 }
 0x828   :  { %v2769_v25 = vpop.eup %2768 }
 0x829   :  { %v1830_v26 = vadd.f32 1.0, %v2769_v25  ;;  %v2771_v29 = vpop.eup %2770 }
 0x82a   :  { %v1831_v6 = vadd.f32 1.0, %v2771_v29  ;;  %v2773_v30 = vpop.eup %2772 }
 0x82b   :  { %2776 = vrcp.f32 %v1830_v26  ;;  %v2775_v40 = vpop.eup %2774 }
 0x82c   :  { %2778 = vrcp.f32 %v1831_v6  ;;  %v1832_v45 = vadd.f32 1.0, %v2775_v40 }
 0x82e   :  { %2780 = vrcp.f32 %v1832_v45 }
 0x835   :  { %v2777_v10 = vpop.eup %2776 }
 0x836   :  { %v1841_v41 = vmul.f32 %v2777_v10, %v2773_v30  ;;  %v2779_v44 = vpop.eup %2778 }
 0x837   :  { %v1840_v53 = vmul.f32 %v2779_v44, %v3328_v37 }
 0x838   :  { %v2781_v33 = vpop.eup %2780 }
 0x839   :  { %v1842_v32 = vadd.f32 %v1841_v41, %v1840_v53 }
 0x83b   :  { %2782 = vtanh.f32 %v1842_v32 }
 0x845   :  { %v2783_v54 = vpop.eup %2782 }
 0x846   :  { %v1844_v57 = vmul.f32 %v2783_v54, %v2781_v33 }
 0x848   :  { %2046 = vmatmul.mubr.f32.vlgmr.msra.gmra.mrb[16].mxu0 %v1844_v57 }
 0x91b   :  { %v1934_v3 = vpop.f32.mrb[16].mxu0 }
 0x91c   :  { %v1935_v4 = vadd.f32 %v1995_v58, %v1934_v3  ;;  %v2047_v7 = vpop.f32.mrb[17].mxu0 }
 0x91e   :  { %1938 = vst.msk [vmem:[%s3398_s6] sm:$0xff] %vm73_vm1, %v1935_v4 }
 0x91f   :  { %1943 = vsyncpa [#allocation4], 1 }

</bundles_post_ra>
